<compile_context>
chip_gen: v7x
topology: tpu7x:2x2x1
jax: 0.10.0
libtpu: 0.0.40
codegen_flags: <defaults>
</compile_context>

<pallas_src>
import functools

import jax
import jax.numpy as jnp
import numpy as np
from jax.experimental import pallas as pl
from jax.experimental.pallas import tpu as pltpu

# ---------------- config (the option_arch dict of the PyTorch module) ---------------
INNER_NC = 4          # conv in-channels
MIDCLASS_NC = 16      # conv out-channels
CLASS_NUM = 10
NORM_GROUPS = 4       # GroupNorm groups   (norm_type='group')
DROPOUT_RATE = 0.1    # inference -> identity
HIDDEN = (MIDCLASS_NC + CLASS_NUM) // 2   # = 13
KH = KW = 3
STRIDE = 2
GN_EPS = 1e-5

CK = INNER_NC * KH * KW        # 36  im2col patch width
CM = MIDCLASS_NC               # 16
G = NORM_GROUPS                # 4
CPG = CM // G                  # 4   channels per group (contiguous, as torch GroupNorm)
LANES = 128                    # lane-dense width for packed params / padded logits
B_TILE = 8                     # samples per grid step (multiple of 8 keeps sublanes aligned)

# packed parameter slab layout: fp32, shape (SLAB_ROWS, 128), zero padded
WC_R = 0                       # rows [0, 36)   conv weight  (CK, CM)
BC_R = 36                      # row  36        conv bias    (1, CM)
GAMMA_R = 37                   # row  37        GN gamma     (1, CM)
BETA_R = 38                    # row  38        GN beta      (1, CM)
B0_R = 39                      # row  39        linear0 bias (1, HIDDEN)
W0_R = 40                      # rows [40, 56)  linear0 W    (CM, HIDDEN)
W1_R = 56                      # rows [56, 69)  linear1 W    (HIDDEN, 128) zero-padded
B1_R = 69                      # row  69        linear1 bias (1, 128)      zero-padded
SLAB_ROWS = 72


# ------------------------------- fused Pallas kernel --------------------------------
def _class001_kernel(p_ref, w_ref, o_ref, *, p):
    """One grid step processes B_TILE samples.

    p_ref : (B_TILE * p, CK)   im2col patches, p = OH*OW rows per sample
    w_ref : (SLAB_ROWS, 128)   packed parameters (resident across grid steps)
    o_ref : (B_TILE, 128)      logits, lanes [0, CLASS_NUM) valid
    """
    m = p_ref.shape[0]                         # B_TILE * p
    b_tile = o_ref.shape[0]

    # ---- packed parameters (static slices of the slab) ----
    wc = w_ref[WC_R:WC_R + CK, 0:CM]                       # (CK, CM)
    bc = w_ref[BC_R:BC_R + 1, 0:CM]                        # (1, CM)
    gamma = w_ref[GAMMA_R:GAMMA_R + 1, 0:CM]               # (1, CM)
    beta = w_ref[BETA_R:BETA_R + 1, 0:CM]                  # (1, CM)
    b0 = w_ref[B0_R:B0_R + 1, 0:HIDDEN]                    # (1, HIDDEN)
    w0 = w_ref[W0_R:W0_R + CM, 0:HIDDEN]                   # (CM, HIDDEN)
    w1 = w_ref[W1_R:W1_R + HIDDEN, :]                      # (HIDDEN, 128)
    b1 = w_ref[B1_R:B1_R + 1, :]                           # (1, 128)

    # ---- conv 3x3 / stride 2 (VALID) as one tall im2col matmul on the MXU ----
    conv = jnp.dot(p_ref[...], wc, preferred_element_type=jnp.float32) + bc   # (m, CM)

    # ---- one-hot row<->sample selector matrices (iota + compare; no integer div) ----
    r_id = jax.lax.broadcasted_iota(jnp.int32, (m, b_tile), 0)
    lo_t = jax.lax.broadcasted_iota(jnp.int32, (m, b_tile), 1) * p
    sel_t = ((r_id >= lo_t) & (r_id < lo_t + p)).astype(jnp.float32)          # (m, B)

    r_id2 = jax.lax.broadcasted_iota(jnp.int32, (b_tile, m), 1)
    lo2 = jax.lax.broadcasted_iota(jnp.int32, (b_tile, m), 0) * p
    sel = ((r_id2 >= lo2) & (r_id2 < lo2 + p)).astype(jnp.float32)            # (B, m)

    # ---- channel<->group one-hot maps, doubled to carry [x | x^2] / [mean | inv] ----
    c_id = jax.lax.broadcasted_iota(jnp.int32, (2 * CM, 2 * G), 0)
    g_lo = jax.lax.broadcasted_iota(jnp.int32, (2 * CM, 2 * G), 1) * CPG
    gmap = ((c_id >= g_lo) & (c_id < g_lo + CPG)).astype(jnp.float32)         # (2CM, 2G)

    c_id2 = jax.lax.broadcasted_iota(jnp.int32, (2 * G, 2 * CM), 1)
    g_lo2 = jax.lax.broadcasted_iota(jnp.int32, (2 * G, 2 * CM), 0) * CPG
    gmap_t = ((c_id2 >= g_lo2) & (c_id2 < g_lo2 + CPG)).astype(jnp.float32)   # (2G, 2CM)

    # ---- GroupNorm statistics: per-sample, per-group E[x] and E[x^2] ----
    inv_cnt = 1.0 / float(p * CPG)                         # elements per group
    stats = jnp.dot(sel, jnp.concatenate([conv, conv * conv], axis=1),
                    preferred_element_type=jnp.float32)    # (B, 2CM) = [sum x | sum x^2]
    gstats = jnp.dot(stats, gmap, preferred_element_type=jnp.float32) * inv_cnt  # (B, 2G)
    mean_g = gstats[:, 0:G]                                # (B, G)
    var_g = jnp.maximum(gstats[:, G:2 * G] - mean_g * mean_g, 0.0)   # biased var, clamped
    inv_g = jax.lax.rsqrt(var_g + GN_EPS)                  # (B, G)

    # broadcast group stats back to channels; fold GN affine into one scale/shift
    mi = jnp.dot(jnp.concatenate([mean_g, inv_g], axis=1), gmap_t,
                 preferred_element_type=jnp.float32)       # (B, 2CM) = [mean_c | inv_c]
    scale_c = mi[:, CM:2 * CM] * gamma                     # (B, CM)
    shift_c = beta - mi[:, 0:CM] * scale_c                 # (B, CM)

    # per-row (per-sample) scale/shift, normalize + ReLU: 1 mul + 1 add per element
    ss = jnp.dot(sel_t, jnp.concatenate([scale_c, shift_c], axis=1),
                 preferred_element_type=jnp.float32)       # (m, 2CM)
    y = jnp.maximum(conv * ss[:, 0:CM] + ss[:, CM:2 * CM], 0.0)      # (m, CM)

    # ---- AdaptiveAvgPool2d((1,1)) + Flatten (dropout = identity in inference) ----
    pooled = jnp.dot(sel, y, preferred_element_type=jnp.float32) * (1.0 / float(p))  # (B, CM)

    # ---- Linear0 -> ReLU -> Linear1 (lane-dense, zero-padded to 128) ----
    h = jnp.maximum(jnp.dot(pooled, w0, preferred_element_type=jnp.float32) + b0, 0.0)
    o_ref[...] = jnp.dot(h, w1, preferred_element_type=jnp.float32) + b1     # (B, 128)


# --------------------------------- JAX glue ------------------------------------------
def _im2col(x):
    """x: (N, C, H, W) -> patches (N, OH*OW, C*KH*KW) matching torch conv weight flatten."""
    n, c, h, w = x.shape
    oh = (h - KH) // STRIDE + 1
    ow = (w - KW) // STRIDE + 1
    cols = []
    for ki in range(KH):
        for kj in range(KW):
            cols.append(x[:, :, ki:ki + STRIDE * oh:STRIDE, kj:kj + STRIDE * ow:STRIDE])
    pat = jnp.stack(cols, axis=2)                       # (N, C, KH*KW, OH, OW)
    pat = pat.reshape(n, c * KH * KW, oh * ow)          # (C, kh, kw) flatten order
    return jnp.transpose(pat, (0, 2, 1)), oh, ow        # (N, OH*OW, C*KH*KW)


def class001_forward(x, param_slab, last_act_type="none", b_tile=B_TILE):
    # TODO(synk): for large H/W, build im2col patches inside the kernel (strided ref
    # reads) instead of materializing the expanded patch tensor in HBM.
    patches, oh, ow = _im2col(x)
    n = x.shape[0]
    p = oh * ow
    ck = x.shape[1] * KH * KW

    n_pad = -(-n // b_tile) * b_tile                    # pad batch to a multiple of b_tile
    if n_pad != n:
        patches = jnp.pad(patches, ((0, n_pad - n), (0, 0), (0, 0)))
    patches2d = patches.reshape(n_pad * p, ck)          # (n_pad*p, ck)
    m = b_tile * p                                      # rows per grid step (multiple of 8)

    kernel = functools.partial(_class001_kernel, p=p)
    out = pl.pallas_call(
        kernel,
        out_shape=jax.ShapeDtypeStruct((n_pad, LANES), jnp.float32),
        grid_spec=pltpu.PrefetchScalarGridSpec(
            num_scalar_prefetch=0,
            grid=(n_pad // b_tile,),
            in_specs=[
                pl.BlockSpec((m, ck), lambda b: (b, 0)),             # B_TILE samples' patches
                pl.BlockSpec((SLAB_ROWS, LANES), lambda b: (0, 0)),  # packed params (resident)
            ],
            out_specs=pl.BlockSpec((b_tile, LANES), lambda b: (b, 0)),
        ),
        compiler_params=pltpu.CompilerParams(dimension_semantics=("parallel",)),
    )(patches2d, param_slab)

    logits = out[:n, :CLASS_NUM]
    if last_act_type == "sigmoid":
        return jax.nn.sigmoid(logits)
    elif last_act_type == "softmax":
        return jax.nn.softmax(logits, axis=-1)
    elif last_act_type == "none":
        return logits
    else:
        raise NotImplementedError(f"last_act_type {last_act_type} is not implemented")


# --------------------------- deterministic parameter setup ---------------------------
def init_params(key):
    ks = jax.random.split(key, 6)
    w_conv = jax.random.normal(ks[0], (MIDCLASS_NC, INNER_NC, KH, KW), jnp.float32) * 0.1
    b_conv = jax.random.normal(ks[1], (MIDCLASS_NC,), jnp.float32) * 0.1
    gamma = 1.0 + 0.05 * jax.random.normal(ks[2], (MIDCLASS_NC,), jnp.float32)
    beta = 0.05 * jax.random.normal(ks[3], (MIDCLASS_NC,), jnp.float32)
    w0 = jax.random.normal(ks[4], (MIDCLASS_NC, HIDDEN), jnp.float32) * 0.2
    b0 = jnp.linspace(-0.1, 0.1, HIDDEN, dtype=jnp.float32)
    w1 = jax.random.normal(ks[5], (HIDDEN, CLASS_NUM), jnp.float32) * 0.2
    b1 = jnp.linspace(-0.1, 0.1, CLASS_NUM, dtype=jnp.float32)

    # pack all parameters into one lane-padded fp32 slab (single kernel input)
    slab = np.zeros((SLAB_ROWS, LANES), np.float32)
    slab[WC_R:WC_R + CK, :CM] = np.asarray(w_conv).reshape(MIDCLASS_NC, CK).T   # (CK, CM)
    slab[BC_R, :CM] = np.asarray(b_conv)
    slab[GAMMA_R, :CM] = np.asarray(gamma)
    slab[BETA_R, :CM] = np.asarray(beta)
    slab[B0_R, :HIDDEN] = np.asarray(b0)
    slab[W0_R:W0_R + CM, :HIDDEN] = np.asarray(w0)
    slab[W1_R:W1_R + HIDDEN, :CLASS_NUM] = np.asarray(w1)
    slab[B1_R, :CLASS_NUM] = np.asarray(b1)
    param_slab = jnp.asarray(slab)

    raw = dict(w_conv=w_conv, b_conv=b_conv, gamma=gamma, beta=beta,
               w0=w0, b0=b0, w1=w1, b1=b1)
    return param_slab, raw


# --------------------------------- pure-JAX reference --------------------------------
def reference_forward(x, raw):
    conv = jax.lax.conv_general_dilated(
        x, raw["w_conv"], (STRIDE, STRIDE), "VALID",
        dimension_numbers=("NCHW", "OIHW", "NCHW")) + raw["b_conv"][None, :, None, None]
    n, c, oh, ow = conv.shape
    g = conv.reshape(n, NORM_GROUPS, c // NORM_GROUPS, oh, ow)
    mean = g.mean(axis=(2, 3, 4), keepdims=True)
    var = g.var(axis=(2, 3, 4), keepdims=True)
    y = ((g - mean) / jnp.sqrt(var + GN_EPS)).reshape(n, c, oh, ow)
    y = y * raw["gamma"][None, :, None, None] + raw["beta"][None, :, None, None]
    y = jnp.maximum(y, 0.0)
    pooled = y.mean(axis=(2, 3))
    h = jnp.maximum(pooled @ raw["w0"] + raw["b0"], 0.0)
    return h @ raw["w1"] + raw["b1"]


if __name__ == "__main__":
    key = jax.random.PRNGKey(0)
    k_x, k_p = jax.random.split(key)
    x = jax.random.normal(k_x, (2, INNER_NC, 16, 16), jnp.float32)   # NCHW, like PyTorch

    param_slab, raw = init_params(k_p)

    out = class001_forward(x, param_slab, last_act_type="none")
    out = jax.block_until_ready(out)

    ref = jax.block_until_ready(reference_forward(x, raw))
    np.testing.assert_allclose(np.asarray(out), np.asarray(ref), rtol=1e-4, atol=1e-4)

    # TODO(synk): nn.Dropout is modelled in inference mode (identity); training-mode
    # stochastic dropout is not implemented.
    print("KERNEL_OK")
</pallas_src>

<mosaic_0001>
module attributes {stable_mosaic.version = 11 : i64} {
  func.func @_class001_kernel(%arg0: i32, %arg1: memref<392x36xf32, #tpu.memory_space<vmem>>, %arg2: memref<72x128xf32, #tpu.memory_space<vmem>>, %arg3: memref<8x128xf32, #tpu.memory_space<vmem>>) attributes {dimension_semantics = [#tpu.dimension_semantics<parallel>], iteration_bounds = array<i64: 1>, scalar_prefetch = 0 : i64, scratch_operands = 0 : i64, tpu.core_type = #tpu.core_type<tc>, window_params = [{transform_indices = @transform_0, window_bounds = array<i64: 392, 36>}, {pipeline_mode = #tpu.pipeline_mode<synchronous>, transform_indices = @transform_1, window_bounds = array<i64: 72, 128>}, {transform_indices = @transform_2, window_bounds = array<i64: 8, 128>}]} {
    %c0 = arith.constant 0 : index
    %c0_0 = arith.constant 0 : index
    %0 = vector.load %arg2[%c0, %c0_0] : memref<72x128xf32, #tpu.memory_space<vmem>>, vector<36x16xf32>
    %c36 = arith.constant 36 : index
    %c0_1 = arith.constant 0 : index
    %1 = vector.load %arg2[%c36, %c0_1] : memref<72x128xf32, #tpu.memory_space<vmem>>, vector<1x16xf32>
    %c37 = arith.constant 37 : index
    %c0_2 = arith.constant 0 : index
    %2 = vector.load %arg2[%c37, %c0_2] : memref<72x128xf32, #tpu.memory_space<vmem>>, vector<1x16xf32>
    %c38 = arith.constant 38 : index
    %c0_3 = arith.constant 0 : index
    %3 = vector.load %arg2[%c38, %c0_3] : memref<72x128xf32, #tpu.memory_space<vmem>>, vector<1x16xf32>
    %c39 = arith.constant 39 : index
    %c0_4 = arith.constant 0 : index
    %4 = vector.load %arg2[%c39, %c0_4] : memref<72x128xf32, #tpu.memory_space<vmem>>, vector<1x13xf32>
    %c40 = arith.constant 40 : index
    %c0_5 = arith.constant 0 : index
    %5 = vector.load %arg2[%c40, %c0_5] : memref<72x128xf32, #tpu.memory_space<vmem>>, vector<16x13xf32>
    %c56 = arith.constant 56 : index
    %c0_6 = arith.constant 0 : index
    %6 = vector.load %arg2[%c56, %c0_6] : memref<72x128xf32, #tpu.memory_space<vmem>>, vector<13x128xf32>
    %c69 = arith.constant 69 : index
    %c0_7 = arith.constant 0 : index
    %7 = vector.load %arg2[%c69, %c0_7] : memref<72x128xf32, #tpu.memory_space<vmem>>, vector<1x128xf32>
    %c0_8 = arith.constant 0 : index
    %c0_9 = arith.constant 0 : index
    %8 = vector.load %arg1[%c0_8, %c0_9] : memref<392x36xf32, #tpu.memory_space<vmem>>, vector<392x36xf32>
    %cst = arith.constant dense<0.000000e+00> : vector<392x16xf32>
    %9 = tpu.matmul %8, %0, %cst {dimension_numbers = #tpu.dot_dimension_numbers<[1], [0], [0], [1], [0, 0, 1, 1], [], []>} : vector<392x36xf32>, vector<36x16xf32>, vector<392x16xf32> -> vector<392x16xf32>
    %10 = vector.broadcast %1 : vector<1x16xf32> to vector<392x16xf32>
    %11 = arith.addf %9, %10 : vector<392x16xf32>
    %12 = tpu.iota {dimensions = array<i32: 0>} : vector<392x8xi32>
    %13 = tpu.iota {dimensions = array<i32: 1>} : vector<392x8xi32>
    %c49_i32 = arith.constant 49 : i32
    %14 = vector.broadcast %c49_i32 : i32 to vector<392x8xi32>
    %15 = arith.muli %13, %14 : vector<392x8xi32>
    %16 = arith.cmpi sge, %12, %15 : vector<392x8xi32>
    %c49_i32_10 = arith.constant 49 : i32
    %17 = vector.broadcast %c49_i32_10 : i32 to vector<392x8xi32>
    %18 = arith.addi %15, %17 : vector<392x8xi32>
    %19 = arith.cmpi slt, %12, %18 : vector<392x8xi32>
    %20 = arith.andi %16, %19 : vector<392x8xi1>
    %21 = arith.extui %20 : vector<392x8xi1> to vector<392x8xi32>
    %22 = arith.sitofp %21 : vector<392x8xi32> to vector<392x8xf32>
    %23 = tpu.iota {dimensions = array<i32: 1>} : vector<8x392xi32>
    %24 = tpu.iota {dimensions = array<i32: 0>} : vector<8x392xi32>
    %c49_i32_11 = arith.constant 49 : i32
    %25 = vector.broadcast %c49_i32_11 : i32 to vector<8x392xi32>
    %26 = arith.muli %24, %25 : vector<8x392xi32>
    %27 = arith.cmpi sge, %23, %26 : vector<8x392xi32>
    %c49_i32_12 = arith.constant 49 : i32
    %28 = vector.broadcast %c49_i32_12 : i32 to vector<8x392xi32>
    %29 = arith.addi %26, %28 : vector<8x392xi32>
    %30 = arith.cmpi slt, %23, %29 : vector<8x392xi32>
    %31 = arith.andi %27, %30 : vector<8x392xi1>
    %32 = arith.extui %31 : vector<8x392xi1> to vector<8x392xi32>
    %33 = arith.sitofp %32 : vector<8x392xi32> to vector<8x392xf32>
    %34 = tpu.iota {dimensions = array<i32: 0>} : vector<32x8xi32>
    %35 = tpu.iota {dimensions = array<i32: 1>} : vector<32x8xi32>
    %c4_i32 = arith.constant 4 : i32
    %36 = vector.broadcast %c4_i32 : i32 to vector<32x8xi32>
    %37 = arith.muli %35, %36 : vector<32x8xi32>
    %38 = arith.cmpi sge, %34, %37 : vector<32x8xi32>
    %c4_i32_13 = arith.constant 4 : i32
    %39 = vector.broadcast %c4_i32_13 : i32 to vector<32x8xi32>
    %40 = arith.addi %37, %39 : vector<32x8xi32>
    %41 = arith.cmpi slt, %34, %40 : vector<32x8xi32>
    %42 = arith.andi %38, %41 : vector<32x8xi1>
    %43 = arith.extui %42 : vector<32x8xi1> to vector<32x8xi32>
    %44 = arith.sitofp %43 : vector<32x8xi32> to vector<32x8xf32>
    %45 = tpu.iota {dimensions = array<i32: 1>} : vector<8x32xi32>
    %46 = tpu.iota {dimensions = array<i32: 0>} : vector<8x32xi32>
    %c4_i32_14 = arith.constant 4 : i32
    %47 = vector.broadcast %c4_i32_14 : i32 to vector<8x32xi32>
    %48 = arith.muli %46, %47 : vector<8x32xi32>
    %49 = arith.cmpi sge, %45, %48 : vector<8x32xi32>
    %c4_i32_15 = arith.constant 4 : i32
    %50 = vector.broadcast %c4_i32_15 : i32 to vector<8x32xi32>
    %51 = arith.addi %48, %50 : vector<8x32xi32>
    %52 = arith.cmpi slt, %45, %51 : vector<8x32xi32>
    %53 = arith.andi %49, %52 : vector<8x32xi1>
    %54 = arith.extui %53 : vector<8x32xi1> to vector<8x32xi32>
    %55 = arith.sitofp %54 : vector<8x32xi32> to vector<8x32xf32>
    %56 = arith.mulf %11, %11 : vector<392x16xf32>
    %57 = tpu.concatenate %11, %56 in 1 : vector<392x16xf32>, vector<392x16xf32> -> vector<392x32xf32>
    %cst_16 = arith.constant dense<0.000000e+00> : vector<8x32xf32>
    %58 = tpu.matmul %33, %57, %cst_16 {dimension_numbers = #tpu.dot_dimension_numbers<[1], [0], [0], [1], [0, 0, 1, 1], [], []>} : vector<8x392xf32>, vector<392x32xf32>, vector<8x32xf32> -> vector<8x32xf32>
    %cst_17 = arith.constant dense<0.000000e+00> : vector<8x8xf32>
    %59 = tpu.matmul %58, %44, %cst_17 {dimension_numbers = #tpu.dot_dimension_numbers<[1], [0], [0], [1], [0, 0, 1, 1], [], []>} : vector<8x32xf32>, vector<32x8xf32>, vector<8x8xf32> -> vector<8x8xf32>
    %cst_18 = arith.constant 0.00510204071 : f32
    %60 = vector.broadcast %cst_18 : f32 to vector<8x8xf32>
    %61 = arith.mulf %59, %60 : vector<8x8xf32>
    %62 = vector.extract_strided_slice %61 {offsets = [0, 0], sizes = [8, 4], strides = [1, 1]} : vector<8x8xf32> to vector<8x4xf32>
    %63 = vector.extract_strided_slice %61 {offsets = [0, 4], sizes = [8, 4], strides = [1, 1]} : vector<8x8xf32> to vector<8x4xf32>
    %64 = arith.mulf %62, %62 : vector<8x4xf32>
    %65 = arith.subf %63, %64 : vector<8x4xf32>
    %cst_19 = arith.constant 0.000000e+00 : f32
    %66 = vector.broadcast %cst_19 : f32 to vector<8x4xf32>
    %67 = arith.maximumf %65, %66 : vector<8x4xf32>
    %cst_20 = arith.constant 9.99999974E-6 : f32
    %68 = vector.broadcast %cst_20 : f32 to vector<8x4xf32>
    %69 = arith.addf %67, %68 : vector<8x4xf32>
    %70 = math.rsqrt %69 : vector<8x4xf32>
    %71 = tpu.concatenate %62, %70 in 1 : vector<8x4xf32>, vector<8x4xf32> -> vector<8x8xf32>
    %cst_21 = arith.constant dense<0.000000e+00> : vector<8x32xf32>
    %72 = tpu.matmul %71, %55, %cst_21 {dimension_numbers = #tpu.dot_dimension_numbers<[1], [0], [0], [1], [0, 0, 1, 1], [], []>} : vector<8x8xf32>, vector<8x32xf32>, vector<8x32xf32> -> vector<8x32xf32>
    %73 = vector.extract_strided_slice %72 {offsets = [0, 16], sizes = [8, 16], strides = [1, 1]} : vector<8x32xf32> to vector<8x16xf32>
    %74 = vector.broadcast %2 : vector<1x16xf32> to vector<8x16xf32>
    %75 = arith.mulf %73, %74 : vector<8x16xf32>
    %76 = vector.extract_strided_slice %72 {offsets = [0, 0], sizes = [8, 16], strides = [1, 1]} : vector<8x32xf32> to vector<8x16xf32>
    %77 = arith.mulf %76, %75 : vector<8x16xf32>
    %78 = vector.broadcast %3 : vector<1x16xf32> to vector<8x16xf32>
    %79 = arith.subf %78, %77 : vector<8x16xf32>
    %80 = tpu.concatenate %75, %79 in 1 : vector<8x16xf32>, vector<8x16xf32> -> vector<8x32xf32>
    %cst_22 = arith.constant dense<0.000000e+00> : vector<392x32xf32>
    %81 = tpu.matmul %22, %80, %cst_22 {dimension_numbers = #tpu.dot_dimension_numbers<[1], [0], [0], [1], [0, 0, 1, 1], [], []>} : vector<392x8xf32>, vector<8x32xf32>, vector<392x32xf32> -> vector<392x32xf32>
    %82 = vector.extract_strided_slice %81 {offsets = [0, 0], sizes = [392, 16], strides = [1, 1]} : vector<392x32xf32> to vector<392x16xf32>
    %83 = arith.mulf %11, %82 : vector<392x16xf32>
    %84 = vector.extract_strided_slice %81 {offsets = [0, 16], sizes = [392, 16], strides = [1, 1]} : vector<392x32xf32> to vector<392x16xf32>
    %85 = arith.addf %83, %84 : vector<392x16xf32>
    %cst_23 = arith.constant 0.000000e+00 : f32
    %86 = vector.broadcast %cst_23 : f32 to vector<392x16xf32>
    %87 = arith.maximumf %85, %86 : vector<392x16xf32>
    %cst_24 = arith.constant dense<0.000000e+00> : vector<8x16xf32>
    %88 = tpu.matmul %33, %87, %cst_24 {dimension_numbers = #tpu.dot_dimension_numbers<[1], [0], [0], [1], [0, 0, 1, 1], [], []>} : vector<8x392xf32>, vector<392x16xf32>, vector<8x16xf32> -> vector<8x16xf32>
    %cst_25 = arith.constant 0.0204081628 : f32
    %89 = vector.broadcast %cst_25 : f32 to vector<8x16xf32>
    %90 = arith.mulf %88, %89 : vector<8x16xf32>
    %cst_26 = arith.constant dense<0.000000e+00> : vector<8x13xf32>
    %91 = tpu.matmul %90, %5, %cst_26 {dimension_numbers = #tpu.dot_dimension_numbers<[1], [0], [0], [1], [0, 0, 1, 1], [], []>} : vector<8x16xf32>, vector<16x13xf32>, vector<8x13xf32> -> vector<8x13xf32>
    %92 = vector.broadcast %4 : vector<1x13xf32> to vector<8x13xf32>
    %93 = arith.addf %91, %92 : vector<8x13xf32>
    %cst_27 = arith.constant 0.000000e+00 : f32
    %94 = vector.broadcast %cst_27 : f32 to vector<8x13xf32>
    %95 = arith.maximumf %93, %94 : vector<8x13xf32>
    %cst_28 = arith.constant dense<0.000000e+00> : vector<8x128xf32>
    %96 = tpu.matmul %95, %6, %cst_28 {dimension_numbers = #tpu.dot_dimension_numbers<[1], [0], [0], [1], [0, 0, 1, 1], [], []>} : vector<8x13xf32>, vector<13x128xf32>, vector<8x128xf32> -> vector<8x128xf32>
    %97 = vector.broadcast %7 : vector<1x128xf32> to vector<8x128xf32>
    %98 = arith.addf %96, %97 : vector<8x128xf32>
    %c0_29 = arith.constant 0 : index
    %c0_30 = arith.constant 0 : index
    %99 = vector.load %arg3[%c0_29, %c0_30] : memref<8x128xf32, #tpu.memory_space<vmem>>, vector<8x128xf32>
    tpu.vector_store %arg3[%c0_29, %c0_30], %98 {strides = array<i32>} : memref<8x128xf32, #tpu.memory_space<vmem>>, vector<8x128xf32>,
    return
  }
  func.func @transform_0(%arg0: i32) -> (i32, i32) {
    %c0_i32 = arith.constant 0 : i32
    %c0_i32_0 = arith.constant 0 : i32
    return %arg0, %c0_i32 : i32, i32
  }
  func.func @transform_1(%arg0: i32) -> (i32, i32) {
    %c0_i32 = arith.constant 0 : i32
    %c0_i32_0 = arith.constant 0 : i32
    %c0_i32_1 = arith.constant 0 : i32
    return %c0_i32, %c0_i32_0 : i32, i32
  }
  func.func @transform_2(%arg0: i32) -> (i32, i32) {
    %c0_i32 = arith.constant 0 : i32
    %c0_i32_0 = arith.constant 0 : i32
    return %arg0, %c0_i32 : i32, i32
  }
}

</mosaic_0001>

<bundles_post_ra>
// kernel: tpu_custom_call.1
= control target key start
LH: loop header
LB: loop body
LE: loop exit
PB: predicated region body
PF: predicated region fallthrough
CT: control target
= control target key end

     0   :  { %v5182_v3 = vmov 0.0|0.0   ;;  %vm3623_vm0 = vmmov 0   ;;  %v5180_v6 = vmov 0.0   ;;  %vm227_vm1 = vcmask 1043456   ;;  %s5175_s0 = inlined_call_operand.vmem [shape: f32[392,36], index: 0, kind: input, shape index: {}]   ;;  %s5176_s1 = inlined_call_operand.vmem [shape: f32[72,128], index: 1, kind: input, shape index: {}]   ;;  %s5177_s2 = inlined_call_operand.hbm [shape: f32[8,128], index: 2, kind: output, shape index: {}]  }
   0x1   :  { %v12_v0 = vld [vmem:[%s5176_s1] sm:$0xff]  ;;  %v13_v1 = vld [vmem:[%s5176_s1 + $0x8] sm:$0xff]  ;;  %v14_v2 = vld [vmem:[%s5176_s1 + $0x10] sm:$0xff]  ;;  %3335 = vmatprep.subr.bf16.mxu0 %v5182_v3  ;;  %3009 = vmatprep.mubr.msk.f32.mxu0 %vm3623_vm0, %v5180_v6  ;;  %vm79_vm2 = vcmask 293888  }
   0x2   :  { %v3336_v4 = vpack.c.bf16 %v13_v1, %v12_v0  ;;  %v15_v5 = vld [vmem:[%s5176_s1 + $0x18] sm:$0xff]  ;;  %v16_v8 = vld [vmem:[%s5176_s1 + $0x20] sm:$0xf] }
   0x3   :  { %v3339_v7 = vpack.c.bf16 %v15_v5, %v14_v2  ;;  %v26_v9 = vld [vmem:[%s5175_s0] sm:$0xff] }
   0x4   :  { %3337 = vmatpush3.bf16.msra.mxu0 %v3336_v4 }
   0x5   :  { %3338 = vmatprep.subr.bf16.mxu0 %v5182_v3 }
   0x8   :  { %3340 = vmatpush3.bf16.msra.mxu0 %v3339_v7 }
   0x9   :  { %3007 = vmatprep.subr.mxu0 %v5180_v6 }
   0xc   :  { %3008 = vmatpush3.msk.msra.mxu0 %vm227_vm1, %v16_v8 }
   0xd   :  { %3010 = vmatmul.mubr.msk.f32.vlgmr.msra.gmra.mrb[0].mxu0 %vm79_vm2, %v26_v9 }
   0xe   :  { %7 = vsyncpa [#allocation3], 0  ;;  %3012 = vmatprep.mubr.msk.f32.mxu0 %vm3623_vm0, %v5180_v6  ;;  %v27_v10 = vld [vmem:[%s5175_s0 + $0x8] sm:$0xff]  ;;  %v28_v11 = vld [vmem:[%s5175_s0 + $0x10] sm:$0xff]  ;;  %s3625_s6 = smov 16   ;;  %vm1139_vm6 = vcmask 130048  }
   0xf   :  { %v29_v12 = vld [vmem:[%s5175_s0 + $0x18] sm:$0xff]  ;;  %v30_v13 = vld [vmem:[%s5175_s0 + $0x20] sm:$0xff]  ;;  %v31_v14 = vld [vmem:[%s5175_s0 + $0x28] sm:$0xff]  ;;  %vm1189_vm13 = vcmask 64512   ;;  %s3628_s7 = smov 4   ;;  %s3629_s10 = smov 112  }
  0x10   :  { %v32_v15 = vld [vmem:[%s5175_s0 + $0x30] sm:$0xff]  ;;  %v33_v16 = vld [vmem:[%s5175_s0 + $0x38] sm:$0xff]  ;;  %v34_v17 = vld [vmem:[%s5175_s0 + $0x40] sm:$0xff]  ;;  %s3631_s25 = smov [#allocation2]  }
  0x11   :  { %3013 = vmatmul.mubr.msk.f32.gmra.mrb[2].mxu0 %vm79_vm2, %v27_v10  ;;  %v35_v18 = vld [vmem:[%s5175_s0 + $0x48] sm:$0xff]  ;;  %v36_v19 = vld [vmem:[%s5175_s0 + $0x50] sm:$0xff]  ;;  %v37_v20 = vld [vmem:[%s5175_s0 + $0x58] sm:$0xff]  ;;  %s2624_s26 = sshll.u32 %s3631_s25, 4  ;;  %s2625_s26 = int_to_ptr.vmem [resolvable:$true] %s2624_s26 }
  0x12   :  { %3015 = vmatprep.mubr.msk.f32.mxu0 %vm3623_vm0, %v5180_v6  ;;  %v38_v21 = vld [vmem:[%s5175_s0 + $0x60] sm:$0xff]  ;;  %v39_v22 = vld [vmem:[%s5175_s0 + $0x68] sm:$0xff]  ;;  %v40_v23 = vld [vmem:[%s5175_s0 + $0x70] sm:$0xff]  ;;  %s3598_s27 = scalar_lea.vmem %s2625_s26, 128  ;;  %p3603_p1 = scmp.lt.s32.totalorder %s2625_s26, %s2625_s26 }
  0x13   :  { %v41_v24 = vld [vmem:[%s5175_s0 + $0x78] sm:$0xff]  ;;  %v42_v25 = vld [vmem:[%s5175_s0 + $0x80] sm:$0xff]  ;;  %v43_v26 = vld [vmem:[%s5175_s0 + $0x88] sm:$0xff]  ;;  %p3599_p0 = scmp.ne.s32.totalorder %s2625_s26, %s3598_s27  ;;  %p3604_p2 = scmp.lt.s32.totalorder %s3598_s27, %s3598_s27 }
  0x14   :  { %v44_v27 = vld [vmem:[%s5175_s0 + $0x90] sm:$0xff]  ;;  %v45_v28 = vld [vmem:[%s5175_s0 + $0x98] sm:$0xff]  ;;  %v46_v29 = vld [vmem:[%s5175_s0 + $0xa0] sm:$0xff] }
  0x15   :  { %3016 = vmatmul.mubr.msk.f32.gmra.mrb[4].mxu0 %vm79_vm2, %v28_v11  ;;  %v47_v30 = vld [vmem:[%s5175_s0 + $0xa8] sm:$0xff]  ;;  %v48_v31 = vld [vmem:[%s5175_s0 + $0xb0] sm:$0xff]  ;;  %v49_v32 = vld [vmem:[%s5175_s0 + $0xb8] sm:$0xff]  ;;  %p3605_p3 = por %p3604_p2, %p3603_p1 }
  0x16   :  { %3018 = vmatprep.mubr.msk.f32.mxu0 %vm3623_vm0, %v5180_v6  ;;  %v50_v33 = vld [vmem:[%s5175_s0 + $0xc0] sm:$0xff]  ;;  %v51_v34 = vld [vmem:[%s5175_s0 + $0xc8] sm:$0xff]  ;;  %v52_v35 = vld [vmem:[%s5175_s0 + $0xd0] sm:$0xff] }
  0x17   :  { %v53_v36 = vld [vmem:[%s5175_s0 + $0xd8] sm:$0xff]  ;;  %v54_v37 = vld [vmem:[%s5175_s0 + $0xe0] sm:$0xff]  ;;  %v55_v38 = vld [vmem:[%s5175_s0 + $0xe8] sm:$0xff]  ;;  %p3606_p4 = pnand %p3605_p3, %p3599_p0 }
  0x18   :  { %v56_v39 = vld [vmem:[%s5175_s0 + $0xf0] sm:$0xff]  ;;  %v57_v40 = vld [vmem:[%s5175_s0 + $0xf8] sm:$0xff]  ;;  %v58_v41 = vld [vmem:[%s5175_s0 + $0x100] sm:$0xff] }
  0x19   :  { %3019 = vmatmul.mubr.msk.f32.gmra.mrb[6].mxu0 %vm79_vm2, %v29_v12  ;;  %v59_v42 = vld [vmem:[%s5175_s0 + $0x108] sm:$0xff]  ;;  %v60_v43 = vld [vmem:[%s5175_s0 + $0x110] sm:$0xff]  ;;  %v61_v44 = vld [vmem:[%s5175_s0 + $0x118] sm:$0xff] }
  0x1a   :  { %3021 = vmatprep.mubr.msk.f32.mxu0 %vm3623_vm0, %v5180_v6  ;;  %v62_v45 = vld [vmem:[%s5175_s0 + $0x120] sm:$0xff]  ;;  %v63_v46 = vld [vmem:[%s5175_s0 + $0x128] sm:$0xff]  ;;  %v64_v47 = vld [vmem:[%s5175_s0 + $0x130] sm:$0xff] }
  0x1b   :  { %v65_v48 = vld [vmem:[%s5175_s0 + $0x138] sm:$0xff]  ;;  %v66_v49 = vld [vmem:[%s5175_s0 + $0x140] sm:$0xff]  ;;  %v67_v50 = vld [vmem:[%s5175_s0 + $0x148] sm:$0xff] }
  0x1c   :  { %v68_v51 = vld [vmem:[%s5175_s0 + $0x150] sm:$0xff]  ;;  %v69_v52 = vld [vmem:[%s5175_s0 + $0x158] sm:$0xff]  ;;  %v70_v53 = vld [vmem:[%s5175_s0 + $0x160] sm:$0xff] }
  0x1d   :  { %3022 = vmatmul.mubr.msk.f32.gmra.mrb[8].mxu0 %vm79_vm2, %v30_v13  ;;  %v71_v54 = vld [vmem:[%s5175_s0 + $0x168] sm:$0xff]  ;;  %v72_v55 = vld [vmem:[%s5175_s0 + $0x170] sm:$0xff]  ;;  %v73_v56 = vld [vmem:[%s5175_s0 + $0x178] sm:$0xff] }
  0x1e   :  { %3024 = vmatprep.mubr.msk.f32.mxu0 %vm3623_vm0, %v5180_v6  ;;  %v74_v57 = vld [vmem:[%s5175_s0 + $0x180] sm:$0xff] }
  0x21   :  { %3025 = vmatmul.mubr.msk.f32.gmra.mrb[10].mxu0 %vm79_vm2, %v31_v14 }
  0x22   :  { %3027 = vmatprep.mubr.msk.f32.mxu0 %vm3623_vm0, %v5180_v6 }
  0x25   :  { %3028 = vmatmul.mubr.msk.f32.gmra.mrb[12].mxu0 %vm79_vm2, %v32_v15 }
  0x26   :  { %3030 = vmatprep.mubr.msk.f32.mxu0 %vm3623_vm0, %v5180_v6 }
  0x29   :  { %3031 = vmatmul.mubr.msk.f32.gmra.mrb[14].mxu0 %vm79_vm2, %v33_v16 }
  0x2a   :  { %3033 = vmatprep.mubr.msk.f32.mxu0 %vm3623_vm0, %v5180_v6 }
  0x2d   :  { %3034 = vmatmul.mubr.msk.f32.gmra.mrb[16].mxu0 %vm79_vm2, %v34_v17 }
  0x2e   :  { %3036 = vmatprep.mubr.msk.f32.mxu0 %vm3623_vm0, %v5180_v6 }
  0x31   :  { %3037 = vmatmul.mubr.msk.f32.gmra.mrb[18].mxu0 %vm79_vm2, %v35_v18 }
  0x32   :  { %3039 = vmatprep.mubr.msk.f32.mxu0 %vm3623_vm0, %v5180_v6 }
  0x35   :  { %3040 = vmatmul.mubr.msk.f32.gmra.mrb[20].mxu0 %vm79_vm2, %v36_v19 }
  0x36   :  { %3042 = vmatprep.mubr.msk.f32.mxu0 %vm3623_vm0, %v5180_v6 }
  0x39   :  { %3043 = vmatmul.mubr.msk.f32.gmra.mrb[22].mxu0 %vm79_vm2, %v37_v20 }
  0x3a   :  { %3045 = vmatprep.mubr.msk.f32.mxu0 %vm3623_vm0, %v5180_v6 }
  0x3d   :  { %3046 = vmatmul.mubr.msk.f32.gmra.mrb[24].mxu0 %vm79_vm2, %v38_v21 }
  0x3e   :  { %3048 = vmatprep.mubr.msk.f32.mxu0 %vm3623_vm0, %v5180_v6 }
  0x41   :  { %3049 = vmatmul.mubr.msk.f32.gmra.mrb[26].mxu0 %vm79_vm2, %v39_v22 }
  0x42   :  { %3051 = vmatprep.mubr.msk.f32.mxu0 %vm3623_vm0, %v5180_v6 }
  0x45   :  { %3052 = vmatmul.mubr.msk.f32.gmra.mrb[28].mxu0 %vm79_vm2, %v40_v23 }
  0x46   :  { %3054 = vmatprep.mubr.msk.f32.mxu0 %vm3623_vm0, %v5180_v6 }
  0x49   :  { %3055 = vmatmul.mubr.msk.f32.gmra.mrb[30].mxu0 %vm79_vm2, %v41_v24 }
  0x4a   :  { %3057 = vmatprep.mubr.msk.f32.mxu0 %vm3623_vm0, %v5180_v6 }
  0x4d   :  { %3058 = vmatmul.mubr.msk.f32.gmra.mrb[32].mxu0 %vm79_vm2, %v42_v25 }
  0x4e   :  { %3060 = vmatprep.mubr.msk.f32.mxu0 %vm3623_vm0, %v5180_v6 }
  0x51   :  { %3061 = vmatmul.mubr.msk.f32.gmra.mrb[34].mxu0 %vm79_vm2, %v43_v26 }
  0x52   :  { %3063 = vmatprep.mubr.msk.f32.mxu0 %vm3623_vm0, %v5180_v6 }
  0x55   :  { %3064 = vmatmul.mubr.msk.f32.gmra.mrb[36].mxu0 %vm79_vm2, %v44_v27 }
  0x56   :  { %3066 = vmatprep.mubr.msk.f32.mxu0 %vm3623_vm0, %v5180_v6 }
  0x59   :  { %3067 = vmatmul.mubr.msk.f32.gmra.mrb[38].mxu0 %vm79_vm2, %v45_v28 }
  0x5a   :  { %3069 = vmatprep.mubr.msk.f32.mxu0 %vm3623_vm0, %v5180_v6 }
  0x5d   :  { %3070 = vmatmul.mubr.msk.f32.gmra.mrb[40].mxu0 %vm79_vm2, %v46_v29 }
  0x5e   :  { %3072 = vmatprep.mubr.msk.f32.mxu0 %vm3623_vm0, %v5180_v6 }
  0x61   :  { %3073 = vmatmul.mubr.msk.f32.gmra.mrb[42].mxu0 %vm79_vm2, %v47_v30  ;;  %v3980_v30 = vld [vmem:[%s5176_s1 + $0x24] ss:$0 sm:$0xff] }
  0x62   :  { %3075 = vmatprep.mubr.msk.f32.mxu0 %vm3623_vm0, %v5180_v6 }
  0x65   :  { %3076 = vmatmul.mubr.msk.f32.gmra.mrb[44].mxu0 %vm79_vm2, %v48_v31 }
  0x66   :  { %3078 = vmatprep.mubr.msk.f32.mxu0 %vm3623_vm0, %v5180_v6 }
  0x69   :  { %3079 = vmatmul.mubr.msk.f32.gmra.mrb[46].mxu0 %vm79_vm2, %v49_v32 }
  0x6a   :  { %3081 = vmatprep.mubr.msk.f32.mxu0 %vm3623_vm0, %v5180_v6 }
  0x6d   :  { %3082 = vmatmul.mubr.msk.f32.gmra.mrb[48].mxu0 %vm79_vm2, %v50_v33 }
  0x6e   :  { %3084 = vmatprep.mubr.msk.f32.mxu0 %vm3623_vm0, %v5180_v6 }
  0x71   :  { %3085 = vmatmul.mubr.msk.f32.gmra.mrb[50].mxu0 %vm79_vm2, %v51_v34 }
  0x72   :  { %3087 = vmatprep.mubr.msk.f32.mxu0 %vm3623_vm0, %v5180_v6 }
  0x75   :  { %3088 = vmatmul.mubr.msk.f32.gmra.mrb[52].mxu0 %vm79_vm2, %v52_v35 }
  0x76   :  { %3090 = vmatprep.mubr.msk.f32.mxu0 %vm3623_vm0, %v5180_v6 }
  0x79   :  { %3091 = vmatmul.mubr.msk.f32.gmra.mrb[54].mxu0 %vm79_vm2, %v53_v36 }
  0x7a   :  { %3093 = vmatprep.mubr.msk.f32.mxu0 %vm3623_vm0, %v5180_v6 }
  0x7d   :  { %3094 = vmatmul.mubr.msk.f32.gmra.mrb[56].mxu0 %vm79_vm2, %v54_v37 }
  0x7e   :  { %3096 = vmatprep.mubr.msk.f32.mxu0 %vm3623_vm0, %v5180_v6 }
  0x81   :  { %3097 = vmatmul.mubr.msk.f32.gmra.mrb[58].mxu0 %vm79_vm2, %v55_v38 }
  0x82   :  { %3099 = vmatprep.mubr.msk.f32.mxu0 %vm3623_vm0, %v5180_v6 }
  0x85   :  { %3100 = vmatmul.mubr.msk.f32.gmra.mrb[60].mxu0 %vm79_vm2, %v56_v39 }
  0x86   :  { %3102 = vmatprep.mubr.msk.f32.mxu0 %vm3623_vm0, %v5180_v6 }
  0x89   :  { %3103 = vmatmul.mubr.msk.f32.gmra.mrb[62].mxu0 %vm79_vm2, %v57_v40 }
  0x8a   :  { %3105 = vmatprep.mubr.msk.f32.mxu0 %vm3623_vm0, %v5180_v6 }
  0x8d   :  { %3106 = vmatmul.mubr.msk.f32.gmra.mrb[64].mxu0 %vm79_vm2, %v58_v41 }
  0x8e   :  { %3108 = vmatprep.mubr.msk.f32.mxu0 %vm3623_vm0, %v5180_v6 }
  0x91   :  { %3109 = vmatmul.mubr.msk.f32.gmra.mrb[66].mxu0 %vm79_vm2, %v59_v42 }
  0x92   :  { %3111 = vmatprep.mubr.msk.f32.mxu0 %vm3623_vm0, %v5180_v6 }
  0x95   :  { %3112 = vmatmul.mubr.msk.f32.gmra.mrb[68].mxu0 %vm79_vm2, %v60_v43 }
  0x96   :  { %3114 = vmatprep.mubr.msk.f32.mxu0 %vm3623_vm0, %v5180_v6 }
  0x99   :  { %3115 = vmatmul.mubr.msk.f32.gmra.mrb[70].mxu0 %vm79_vm2, %v61_v44 }
  0x9a   :  { %3117 = vmatprep.mubr.msk.f32.mxu0 %vm3623_vm0, %v5180_v6 }
  0x9d   :  { %3118 = vmatmul.mubr.msk.f32.gmra.mrb[72].mxu0 %vm79_vm2, %v62_v45 }
  0x9e   :  { %3120 = vmatprep.mubr.msk.f32.mxu0 %vm3623_vm0, %v5180_v6 }
  0xa1   :  { %3121 = vmatmul.mubr.msk.f32.gmra.mrb[74].mxu0 %vm79_vm2, %v63_v46 }
  0xa2   :  { %3123 = vmatprep.mubr.msk.f32.mxu0 %vm3623_vm0, %v5180_v6 }
  0xa5   :  { %3124 = vmatmul.mubr.msk.f32.gmra.mrb[76].mxu0 %vm79_vm2, %v64_v47 }
  0xa6   :  { %3126 = vmatprep.mubr.msk.f32.mxu0 %vm3623_vm0, %v5180_v6 }
  0xa9   :  { %3127 = vmatmul.mubr.msk.f32.gmra.mrb[78].mxu0 %vm79_vm2, %v65_v48 }
  0xaa   :  { %3129 = vmatprep.mubr.msk.f32.mxu0 %vm3623_vm0, %v5180_v6 }
  0xad   :  { %3130 = vmatmul.mubr.msk.f32.gmra.mrb[80].mxu0 %vm79_vm2, %v66_v49 }
  0xae   :  { %3132 = vmatprep.mubr.msk.f32.mxu0 %vm3623_vm0, %v5180_v6 }
  0xb1   :  { %3133 = vmatmul.mubr.msk.f32.gmra.mrb[82].mxu0 %vm79_vm2, %v67_v50 }
  0xb2   :  { %3135 = vmatprep.mubr.msk.f32.mxu0 %vm3623_vm0, %v5180_v6 }
  0xb5   :  { %3136 = vmatmul.mubr.msk.f32.gmra.mrb[84].mxu0 %vm79_vm2, %v68_v51 }
  0xb6   :  { %3138 = vmatprep.mubr.msk.f32.mxu0 %vm3623_vm0, %v5180_v6 }
  0xb9   :  { %3139 = vmatmul.mubr.msk.f32.gmra.mrb[86].mxu0 %vm79_vm2, %v69_v52 }
  0xba   :  { %3141 = vmatprep.mubr.msk.f32.mxu0 %vm3623_vm0, %v5180_v6 }
  0xbd   :  { %3142 = vmatmul.mubr.msk.f32.gmra.mrb[88].mxu0 %vm79_vm2, %v70_v53 }
  0xbe   :  { %3144 = vmatprep.mubr.msk.f32.mxu0 %vm3623_vm0, %v5180_v6 }
  0xc1   :  { %3145 = vmatmul.mubr.msk.f32.gmra.mrb[90].mxu0 %vm79_vm2, %v71_v54 }
  0xc2   :  { %3147 = vmatprep.mubr.msk.f32.mxu0 %vm3623_vm0, %v5180_v6 }
  0xc5   :  { %3148 = vmatmul.mubr.msk.f32.gmra.mrb[92].mxu0 %vm79_vm2, %v72_v55 }
  0xc6   :  { %3150 = vmatprep.mubr.msk.f32.mxu0 %vm3623_vm0, %v5180_v6 }
  0xc9   :  { %3151 = vmatmul.mubr.msk.f32.gmra.mrb[94].mxu0 %vm79_vm2, %v73_v56 }
  0xca   :  { %3153 = vmatprep.mubr.msk.f32.mxu0 %vm3623_vm0, %v5180_v6 }
  0xcd   :  { %3154 = vmatmul.mubr.msk.f32.gmra.mrb[96].mxu0 %vm79_vm2, %v74_v57 }
  0xe0   :  { %v297_v58 = vpop.f32.mrb[0].mxu0 }
  0xe1   :  { %v3011_v59 = vpop.f32.mrb[1].mxu0  ;;  %v3992_v36 = vadd.f32 %v3980_v30, %v297_v58 }
  0xe3   :  { %v894_v43 = vmul.f32 %v3992_v36, %v3992_v36 }
  0xe4   :  { %v302_v60 = vpop.f32.mrb[2].mxu0 }
  0xe5   :  { %v3014_v61 = vpop.f32.mrb[3].mxu0  ;;  %v3986_v33 = vadd.f32 %v3980_v30, %v302_v60 }
  0xe7   :  { %v895_v40 = vmul.f32 %v3986_v33, %v3986_v33 }
  0xe8   :  { %v307_v62 = vpop.f32.mrb[4].mxu0 }
  0xe9   :  { %v3017_v63 = vpop.f32.mrb[5].mxu0  ;;  %v3481_v49 = vpack.i.bf16 %v895_v40, %v894_v43  ;;  %v4013_v50 = vadd.f32 %v3980_v30, %v307_v62 }
  0xeb   :  { %v896_v58 = vmul.f32 %v4013_v50, %v4013_v50 }
  0xec   :  { %v312_v0 = vpop.f32.mrb[6].mxu0 }
  0xed   :  { %v3020_v1 = vpop.f32.mrb[7].mxu0  ;;  %v4007_v46 = vadd.f32 %v3980_v30, %v312_v0 }
  0xef   :  { %v897_v54 = vmul.f32 %v4007_v46, %v4007_v46 }
  0xf0   :  { %v317_v2 = vpop.f32.mrb[8].mxu0 }
  0xf1   :  { %v3023_v4 = vpop.f32.mrb[9].mxu0  ;;  %v4028_v59 = vadd.f32 %v3980_v30, %v317_v2 }
  0xf2   :  { %v3491_v4 = vpack.i.bf16 %v897_v54, %v896_v58 }
  0xf3   :  { %v898_v2 = vmul.f32 %v4028_v59, %v4028_v59 }
  0xf4   :  { %v322_v5 = vpop.f32.mrb[10].mxu0 }
  0xf5   :  { %v3026_v7 = vpop.f32.mrb[11].mxu0  ;;  %v4023_v55 = vadd.f32 %v3980_v30, %v322_v5 }
  0xf7   :  { %v899_v62 = vmul.f32 %v4023_v55, %v4023_v55 }
  0xf8   :  { %v3959_v8 = vpop.f32.mrb[12].mxu0 }
  0xf9   :  { %v3029_v9 = vpop.f32.mrb[13].mxu0  ;;  %v4046_v5 = vadd.f32 %v3980_v30, %v3959_v8 }
  0xfc   :  { %v332_v10 = vpop.f32.mrb[14].mxu0 }
  0xfd   :  { %v3032_v11 = vpop.f32.mrb[15].mxu0  ;;  %v4037_v63 = vadd.f32 %v3980_v30, %v332_v10 }
  0xff   :  { %v901_v11 = vmul.f32 %v4037_v63, %v4037_v63 }
 0x100   :  { %v3961_v12 = vpop.f32.mrb[16].mxu0 }
 0x101   :  { %v3035_v13 = vpop.f32.mrb[17].mxu0 }
 0x104   :  { %v3963_v14 = vpop.f32.mrb[18].mxu0 }
 0x105   :  { %v3038_v15 = vpop.f32.mrb[19].mxu0  ;;  %v4057_v13 = vadd.f32 %v3980_v30, %v3963_v14 }
 0x107   :  { %v903_v14 = vmul.f32 %v4057_v13, %v4057_v13 }
 0x108   :  { %v3965_v16 = vpop.f32.mrb[20].mxu0 }
 0x109   :  { %v3041_v17 = vpop.f32.mrb[21].mxu0 }
 0x10a   :  { %v3496_v17 = vpack.i.bf16 %v899_v62, %v898_v2 }
 0x10c   :  { %v3967_v18 = vpop.f32.mrb[22].mxu0 }
 0x10d   :  { %v3044_v19 = vpop.f32.mrb[23].mxu0 }
 0x10e   :  { %v900_v19 = vmul.f32 %v4046_v5, %v4046_v5 }
 0x110   :  { %v3969_v20 = vpop.f32.mrb[24].mxu0 }
 0x111   :  { %v3047_v21 = vpop.f32.mrb[25].mxu0 }
 0x112   :  { %v4063_v21 = vadd.f32 %v3980_v30, %v3961_v12 }
 0x114   :  { %v3971_v22 = vpop.f32.mrb[26].mxu0 }
 0x115   :  { %v3050_v23 = vpop.f32.mrb[27].mxu0  ;;  %v4094_v40 = vadd.f32 %v3980_v30, %v3971_v22 }
 0x117   :  { %v907_v22 = vmul.f32 %v4094_v40, %v4094_v40 }
 0x118   :  { %v3973_v24 = vpop.f32.mrb[28].mxu0 }
 0x119   :  { %v3053_v25 = vpop.f32.mrb[29].mxu0 }
 0x11c   :  { %v3975_v26 = vpop.f32.mrb[30].mxu0 }
 0x11d   :  { %v3056_v27 = vpop.f32.mrb[31].mxu0 }
 0x11e   :  { %v4074_v27 = vadd.f32 %v3980_v30, %v3967_v18 }
 0x120   :  { %v377_v28 = vpop.f32.mrb[32].mxu0 }
 0x121   :  { %v3059_v29 = vpop.f32.mrb[33].mxu0  ;;  %v3983_v31 = vadd.f32 %v3980_v30, %v377_v28 }
 0x122   :  { %v3501_v29 = vpack.i.bf16 %v901_v11, %v900_v19 }
 0x123   :  { %v910_v37 = vmul.f32 %v3983_v31, %v3983_v31 }
 0x124   :  { %v382_v32 = vpop.f32.mrb[34].mxu0 }
 0x125   :  { %v3989_v34 = vadd.f32 %v3980_v30, %v382_v32  ;;  %v3062_v35 = vpop.f32.mrb[35].mxu0  ;;  %v902_v32 = vmul.f32 %v4063_v21, %v4063_v21 }
 0x126   :  { %v4083_v35 = vadd.f32 %v3980_v30, %v3965_v16 }
 0x127   :  { %v911_v38 = vmul.f32 %v3989_v34, %v3989_v34 }
 0x128   :  { %v387_v39 = vpop.f32.mrb[36].mxu0  ;;  %v904_v43 = vmul.f32 %v4083_v35, %v4083_v35 }
 0x129   :  { %v3065_v41 = vpop.f32.mrb[37].mxu0  ;;  %v3476_v42 = vpack.i.bf16 %v911_v38, %v910_v37  ;;  %v4003_v44 = vadd.f32 %v3980_v30, %v387_v39  ;;  %v905_v39 = vmul.f32 %v4074_v27, %v4074_v27 }
 0x12b   :  { %5222 = vst [vmem:[#allocation5_spill] sm:$0xff] %v4003_v44  ;;  %3477 = vrot.lane.b32.xlu0 %v3476_v42, %s3625_s6  ;;  %v912_v51 = vmul.f32 %v4003_v44, %v4003_v44  ;;  %v3506_v42 = vpack.i.bf16 %v903_v14, %v902_v32 }
 0x12c   :  { %v392_v45 = vpop.f32.mrb[38].mxu0 }
 0x12d   :  { %v4010_v47 = vadd.f32 %v3980_v30, %v392_v45  ;;  %v3068_v48 = vpop.f32.mrb[39].mxu0  ;;  %v4100_v45 = vadd.f32 %v3980_v30, %v3969_v20 }
 0x12f   :  { %3482 = vrot.lane.b32.xlu0 %v3481_v49, %s3625_s6  ;;  %v913_v52 = vmul.f32 %v4010_v47, %v4010_v47  ;;  %v906_v54 = vmul.f32 %v4100_v45, %v4100_v45 }
 0x130   :  { %v397_v53 = vpop.f32.mrb[40].mxu0 }
 0x131   :  { %v3071_v56 = vpop.f32.mrb[41].mxu0  ;;  %v3486_v57 = vpack.i.bf16 %v913_v52, %v912_v51  ;;  %v4031_v60 = vadd.f32 %v3980_v30, %v397_v53  ;;  %v4111_v51 = vadd.f32 %v3980_v30, %v3975_v26  ;;  %v3511_v53 = vpack.i.bf16 %v905_v39, %v904_v43 }
 0x132   :  { %v4120_v56 = vadd.f32 %v3980_v30, %v3973_v24  ;;  %v541_v39 = vlaneseq }
 0x133   :  { %3487 = vrot.lane.b32.xlu1 %v3486_v57, %s3625_s6  ;;  %v914_v7 = vmul.f32 %v4031_v60, %v4031_v60  ;;  %5224 = vst [vmem:[#allocation7_spill] sm:$0xff] %v4111_v51 }
 0x134   :  { %v402_v61 = vpop.f32.mrb[42].mxu0  ;;  %5225 = vst [vmem:[#allocation8_spill] sm:$0xff] %v4120_v56  ;;  %v908_v2 = vmul.f32 %v4120_v56, %v4120_v56 }
 0x135   :  { %v4040_v0 = vadd.f32 %v3980_v30, %v402_v61  ;;  %v3074_v1 = vpop.f32.mrb[43].mxu0  ;;  %v909_v61 = vmul.f32 %v4111_v51, %v4111_v51 }
 0x136   :  { %v3516_v1 = vpack.i.bf16 %v907_v22, %v906_v54  ;;  %v4161_v22 = vand.u32 127, %v541_v39 }
 0x137   :  { %5223 = vst [vmem:[#allocation6_spill] sm:$0xff] %v4040_v0  ;;  %v915_v9 = vmul.f32 %v4040_v0, %v4040_v0  ;;  %3492 = vrot.lane.b32.xlu1 %v3491_v4, %s3625_s6  ;;  %v3551_v11 = vpack.i.bf16 %v909_v61, %v908_v2  ;;  %v5178_v2 = vmov 1.0  }
 0x138   :  { %v407_v10 = vpop.f32.mrb[44].mxu0 }
 0x139   :  { %v3077_v15 = vpop.f32.mrb[45].mxu0  ;;  %v3521_v8 = vpack.i.bf16 %v915_v9, %v914_v7  ;;  %v4066_v23 = vadd.f32 %v3980_v30, %v407_v10 }
 0x13b   :  { %3497 = vrot.lane.b32.xlu1 %v3496_v17, %s3625_s6  ;;  %3522 = vrot.lane.b32.xlu0 %v3521_v8, %s3625_s6  ;;  %v916_v37 = vmul.f32 %v4066_v23, %v4066_v23 }
 0x13c   :  { %v412_v25 = vpop.f32.mrb[46].mxu0 }
 0x13d   :  { %v4077_v28 = vadd.f32 %v3980_v30, %v412_v25  ;;  %v3080_v12 = vpop.f32.mrb[47].mxu0 }
 0x13f   :  { %v917_v38 = vmul.f32 %v4077_v28, %v4077_v28  ;;  %3502 = vrot.lane.b32.xlu1 %v3501_v29, %s3625_s6 }
 0x140   :  { %v417_v18 = vpop.f32.mrb[48].mxu0 }
 0x141   :  { %v3083_v41 = vpop.f32.mrb[49].mxu0  ;;  %v3526_v16 = vpack.i.bf16 %v917_v38, %v916_v37  ;;  %v4103_v48 = vadd.f32 %v3980_v30, %v417_v18 }
 0x143   :  { %3507 = vrot.lane.b32.xlu1 %v3506_v42, %s3625_s6  ;;  %3527 = vrot.lane.b32.xlu0 %v3526_v16, %s3625_s6  ;;  %v918_v57 = vmul.f32 %v4103_v48, %v4103_v48  ;;  %v4155_v16 = vshrl.u32 %v541_v39, 7 }
 0x144   :  { %v422_v49 = vpop.f32.mrb[50].mxu0 }
 0x145   :  { %v4114_v52 = vadd.f32 %v3980_v30, %v422_v49  ;;  %v3086_v20 = vpop.f32.mrb[51].mxu0  ;;  %5228 = vst [vmem:[#allocation11_spill] sm:$0xff] %v4155_v16 }
 0x146   :  { %v4164_v20 = vmul.u32 49, %v4155_v16 }
 0x147   :  { %v919_v58 = vmul.f32 %v4114_v52, %v4114_v52  ;;  %3512 = vrot.lane.b32.xlu1 %v3511_v53, %s3625_s6 }
 0x148   :  { %v427_v26 = vpop.f32.mrb[52].mxu0  ;;  %vm844_vm9 = vcmp.ge.s32.totalorder %v4161_v22, %v4164_v20 }
 0x149   :  { %v3089_v62 = vpop.f32.mrb[53].mxu0  ;;  %v3531_v4 = vpack.i.bf16 %v919_v58, %v918_v57  ;;  %v4132_v24 = vadd.f32 %v3980_v30, %v427_v26  ;;  %v840_v57 = vadd.s32 128, %v4161_v22  ;;  %v4171_v58 = vadd.s32 49, %v4164_v20 }
 0x14b   :  { %3517 = vrot.lane.b32.xlu1 %v3516_v1, %s3625_s6  ;;  %3532 = vrot.lane.b32.xlu0 %v3531_v4, %s3625_s6  ;;  %v920_v15 = vmul.f32 %v4132_v24, %v4132_v24  ;;  %vm845_vm3 = vcmp.ge.s32.totalorder %v840_v57, %v4164_v20  ;;  %vm850_vm4 = vcmp.lt.s32.totalorder %v840_v57, %v4171_v58 }
 0x14c   :  { %v432_v7 = vpop.f32.mrb[54].mxu0  ;;  %vm854_vm5 = vmand %vm845_vm3, %vm850_vm4  ;;  %vm849_vm10 = vcmp.lt.s32.totalorder %v4161_v22, %v4171_v58 }
 0x14d   :  { %v4137_v9 = vadd.f32 %v3980_v30, %v432_v7  ;;  %v3092_v10 = vpop.f32.mrb[55].mxu0  ;;  %2741 = vmatprep.mubr.msk.f32.mxu1 %vm854_vm5, %v5178_v2  ;;  %2803 = vmatprep.mubr.msk.f32.mxu0 %vm854_vm5, %v5178_v2  ;;  %vm4347_vm12 = vmand %vm844_vm9, %vm849_vm10 }
 0x14f   :  { %v921_v17 = vmul.f32 %v4137_v9, %v4137_v9  ;;  %3552 = vrot.lane.b32.xlu1 %v3551_v11, %s3625_s6 }
 0x150   :  { %v437_v8 = vpop.f32.mrb[56].mxu0 }
 0x151   :  { %v3095_v19 = vpop.f32.mrb[57].mxu0  ;;  %v3536_v25 = vpack.i.bf16 %v921_v17, %v920_v15  ;;  %v4145_v14 = vadd.f32 %v3980_v30, %v437_v8 }
 0x153   :  { %5226 = vst [vmem:[#allocation9_spill] sm:$0xff] %v4145_v14  ;;  %3537 = vrot.lane.b32.xlu0 %v3536_v25, %s3625_s6  ;;  %v922_v37 = vmul.f32 %v4145_v14, %v4145_v14 }
 0x154   :  { %v442_v12 = vpop.f32.mrb[58].mxu0 }
 0x155   :  { %v4149_v29 = vadd.f32 %v3980_v30, %v442_v12  ;;  %v3098_v32 = vpop.f32.mrb[59].mxu0 }
 0x157   :  { %5227 = vst [vmem:[#allocation10_spill] sm:$0xff] %v4149_v29  ;;  %v923_v38 = vmul.f32 %v4149_v29, %v4149_v29 }
 0x158   :  { %v447_v18 = vpop.f32.mrb[60].mxu0 }
 0x159   :  { %v3101_v41 = vpop.f32.mrb[61].mxu0  ;;  %v3541_v42 = vpack.i.bf16 %v923_v38, %v922_v37  ;;  %v4158_v43 = vadd.f32 %v3980_v30, %v447_v18 }
 0x15b   :  { %5229 = vst [vmem:[#allocation12_spill] sm:$0xff] %v4158_v43  ;;  %3542 = vrot.lane.b32.xlu0 %v3541_v42, %s3625_s6  ;;  %v924_v26 = vmul.f32 %v4158_v43, %v4158_v43 }
 0x15c   :  { %v452_v49 = vpop.f32.mrb[62].mxu0 }
 0x15d   :  { %v4167_v53 = vadd.f32 %v3980_v30, %v452_v49  ;;  %v3104_v54 = vpop.f32.mrb[63].mxu0 }
 0x15f   :  { %5230 = vst [vmem:[#allocation13_spill] sm:$0xff] %v4167_v53  ;;  %v925_v61 = vmul.f32 %v4167_v53, %v4167_v53 }
 0x160   :  { %v457_v62 = vpop.f32.mrb[64].mxu0 }
 0x161   :  { %v3107_v1 = vpop.f32.mrb[65].mxu0  ;;  %v3546_v4 = vpack.i.bf16 %v925_v61, %v924_v26  ;;  %v4182_v7 = vadd.f32 %v3980_v30, %v457_v62 }
 0x163   :  { %5231 = vst [vmem:[#allocation14_spill] sm:$0xff] %v4182_v7  ;;  %3547 = vrot.lane.b32.xlu0 %v3546_v4, %s3625_s6  ;;  %v926_v17 = vmul.f32 %v4182_v7, %v4182_v7 }
 0x164   :  { %v462_v10 = vpop.f32.mrb[66].mxu0 }
 0x165   :  { %v4186_v11 = vadd.f32 %v3980_v30, %v462_v10  ;;  %v3110_v15 = vpop.f32.mrb[67].mxu0 }
 0x167   :  { %5232 = vst [vmem:[#allocation15_spill] sm:$0xff] %v4186_v11  ;;  %v927_v8 = vmul.f32 %v4186_v11, %v4186_v11 }
 0x168   :  { %v467_v19 = vpop.f32.mrb[68].mxu0 }
 0x169   :  { %v3113_v25 = vpop.f32.mrb[69].mxu0  ;;  %v3556_v12 = vpack.i.bf16 %v927_v8, %v926_v17  ;;  %v4193_v32 = vadd.f32 %v3980_v30, %v467_v19 }
 0x16b   :  { %5233 = vst [vmem:[#allocation16_spill] sm:$0xff] %v4193_v32  ;;  %3557 = vrot.lane.b32.xlu0 %v3556_v12, %s3625_s6  ;;  %v928_v39 = vmul.f32 %v4193_v32, %v4193_v32 }
 0x16c   :  { %v472_v37 = vpop.f32.mrb[70].mxu0 }
 0x16d   :  { %v4197_v38 = vadd.f32 %v3980_v30, %v472_v37  ;;  %v3116_v18 = vpop.f32.mrb[71].mxu0 }
 0x16f   :  { %5234 = vst [vmem:[#allocation17_spill] sm:$0xff] %v4197_v38  ;;  %v929_v41 = vmul.f32 %v4197_v38, %v4197_v38 }
 0x170   :  { %v477_v42 = vpop.f32.mrb[72].mxu0 }
 0x171   :  { %v3119_v49 = vpop.f32.mrb[73].mxu0  ;;  %v3561_v54 = vpack.i.bf16 %v929_v41, %v928_v39  ;;  %v4204_v57 = vadd.f32 %v3980_v30, %v477_v42 }
 0x173   :  { %5235 = vst [vmem:[#allocation18_spill] sm:$0xff] %v4204_v57  ;;  %3562 = vrot.lane.b32.xlu1 %v3561_v54, %s3625_s6  ;;  %v930_v1 = vmul.f32 %v4204_v57, %v4204_v57 }
 0x174   :  { %v482_v26 = vpop.f32.mrb[74].mxu0 }
 0x175   :  { %v4208_v61 = vadd.f32 %v3980_v30, %v482_v26  ;;  %v3122_v62 = vpop.f32.mrb[75].mxu0 }
 0x177   :  { %5236 = vst [vmem:[#allocation19_spill] sm:$0xff] %v4208_v61  ;;  %v931_v4 = vmul.f32 %v4208_v61, %v4208_v61 }
 0x178   :  { %v487_v10 = vpop.f32.mrb[76].mxu0 }
 0x179   :  { %v3125_v15 = vpop.f32.mrb[77].mxu0  ;;  %v3566_v17 = vpack.i.bf16 %v931_v4, %v930_v1  ;;  %v4215_v8 = vadd.f32 %v3980_v30, %v487_v10 }
 0x17b   :  { %5237 = vst [vmem:[#allocation20_spill] sm:$0xff] %v4215_v8  ;;  %3567 = vrot.lane.b32.xlu0 %v3566_v17, %s3625_s6  ;;  %v932_v37 = vmul.f32 %v4215_v8, %v4215_v8 }
 0x17c   :  { %v492_v19 = vpop.f32.mrb[78].mxu0 }
 0x17d   :  { %v4219_v25 = vadd.f32 %v3980_v30, %v492_v19  ;;  %v3128_v12 = vpop.f32.mrb[79].mxu0 }
 0x17f   :  { %5238 = vst [vmem:[#allocation21_spill] sm:$0xff] %v4219_v25  ;;  %v933_v18 = vmul.f32 %v4219_v25, %v4219_v25 }
 0x180   :  { %v497_v39 = vpop.f32.mrb[80].mxu0 }
 0x181   :  { %v3131_v41 = vpop.f32.mrb[81].mxu0  ;;  %v3571_v42 = vpack.i.bf16 %v933_v18, %v932_v37  ;;  %v4226_v49 = vadd.f32 %v3980_v30, %v497_v39 }
 0x183   :  { %5239 = vst [vmem:[#allocation22_spill] sm:$0xff] %v4226_v49  ;;  %3572 = vrot.lane.b32.xlu1 %v3571_v42, %s3625_s6  ;;  %v934_v1 = vmul.f32 %v4226_v49, %v4226_v49 }
 0x184   :  { %v502_v54 = vpop.f32.mrb[82].mxu0 }
 0x185   :  { %v4230_v26 = vadd.f32 %v3980_v30, %v502_v54  ;;  %v3134_v62 = vpop.f32.mrb[83].mxu0 }
 0x187   :  { %5240 = vst [vmem:[#allocation23_spill] sm:$0xff] %v4230_v26  ;;  %v935_v4 = vmul.f32 %v4230_v26, %v4230_v26 }
 0x188   :  { %v507_v10 = vpop.f32.mrb[84].mxu0 }
 0x189   :  { %v3137_v15 = vpop.f32.mrb[85].mxu0  ;;  %v3576_v17 = vpack.i.bf16 %v935_v4, %v934_v1  ;;  %v4237_v19 = vadd.f32 %v3980_v30, %v507_v10 }
 0x18b   :  { %5241 = vst [vmem:[#allocation24_spill] sm:$0xff] %v4237_v19  ;;  %3577 = vrot.lane.b32.xlu0 %v3576_v17, %s3625_s6  ;;  %v936_v39 = vmul.f32 %v4237_v19, %v4237_v19 }
 0x18c   :  { %v512_v12 = vpop.f32.mrb[86].mxu0 }
 0x18d   :  { %v4241_v37 = vadd.f32 %v3980_v30, %v512_v12  ;;  %v3140_v18 = vpop.f32.mrb[87].mxu0 }
 0x18f   :  { %5242 = vst [vmem:[#allocation25_spill] sm:$0xff] %v4241_v37  ;;  %v937_v41 = vmul.f32 %v4241_v37, %v4241_v37 }
 0x190   :  { %v517_v42 = vpop.f32.mrb[88].mxu0 }
 0x191   :  { %v3143_v54 = vpop.f32.mrb[89].mxu0  ;;  %v3581_v62 = vpack.i.bf16 %v937_v41, %v936_v39  ;;  %v4248_v1 = vadd.f32 %v3980_v30, %v517_v42 }
 0x193   :  { %5243 = vst [vmem:[#allocation26_spill] sm:$0xff] %v4248_v1  ;;  %3582 = vrot.lane.b32.xlu1 %v3581_v62, %s3625_s6  ;;  %v938_v17 = vmul.f32 %v4248_v1, %v4248_v1 }
 0x194   :  { %v522_v4 = vpop.f32.mrb[90].mxu0 }
 0x195   :  { %v4252_v10 = vadd.f32 %v3980_v30, %v522_v4  ;;  %v3146_v15 = vpop.f32.mrb[91].mxu0 }
 0x197   :  { %5244 = vst [vmem:[#allocation27_spill] sm:$0xff] %v4252_v10  ;;  %v939_v12 = vmul.f32 %v4252_v10, %v4252_v10 }
 0x198   :  { %v527_v18 = vpop.f32.mrb[92].mxu0 }
 0x199   :  { %v3149_v2 = vpop.f32.mrb[93].mxu0  ;;  %v3586_v54 = vpack.i.bf16 %v939_v12, %v938_v17  ;;  %v4259_v39 = vadd.f32 %v3980_v30, %v527_v18 }
 0x19b   :  { %5245 = vst [vmem:[#allocation28_spill] sm:$0xff] %v4259_v39  ;;  %3587 = vrot.lane.b32.xlu0 %v3586_v54, %s3625_s6  ;;  %v940_v3 = vmul.f32 %v4259_v39, %v4259_v39 }
 0x19c   :  { %v532_v41 = vpop.f32.mrb[94].mxu0 }
 0x19d   :  { %v4263_v42 = vadd.f32 %v3980_v30, %v532_v41  ;;  %v3478_v62 = vpop.permute.xlu0 %3477  ;;  %v3152_v4 = vpop.f32.mrb[95].mxu0 }
 0x19e   :  { %v3480_v15 = vunpack.i.h.bf16 %v3478_v62  ;;  %v3479_v6 = vunpack.i.l.bf16 %v3478_v62 }
 0x19f   :  { %5246 = vst [vmem:[#allocation29_spill] sm:$0xff] %v4263_v42  ;;  %v941_v2 = vmul.f32 %v4263_v42, %v4263_v42 }
 0x1a0   :  { %v537_v17 = vpop.f32.mrb[96].mxu0  ;;  %v1156_v12 = vsel %vm1139_vm6, %v3983_v31, %v3479_v6  ;;  %v1157_v18 = vsel %vm1139_vm6, %v3989_v34, %v3480_v15 }
 0x1a1   :  { %v4274_v54 = vadd.f32 %v3980_v30, %v537_v17  ;;  %v3483_v41 = vpop.permute.xlu0 %3482  ;;  %v3341_v4 = vpack.c.bf16 %v1157_v18, %v1156_v12  ;;  %v3591_v16 = vpack.i.bf16 %v941_v2, %v940_v3  ;;  %v3155_v62 = vpop.f32.mrb[97].mxu0 }
 0x1a2   :  { %v3485_v1 = vunpack.i.h.bf16 %v3483_v41  ;;  %v3484_v10 = vunpack.i.l.bf16 %v3483_v41 }
 0x1a3   :  { %5247 = vst [vmem:[#allocation30_spill] sm:$0xff] %v4274_v54  ;;  %3342 = vmatprep.subr.bf16.mxu1 %v3341_v4  ;;  %3592 = vrot.lane.b32.xlu1 %v3591_v16, %s3625_s6  ;;  %v942_v39 = vmul.f32 %v4274_v54, %v4274_v54 }
 0x1a4   :  { %v1140_v6 = vsel %vm1139_vm6, %v3992_v36, %v3484_v10  ;;  %v1141_v15 = vsel %vm1139_vm6, %v3986_v33, %v3485_v1 }
 0x1a5   :  { %v3488_v30 = vpop.permute.xlu1 %3487  ;;  %1088 = vrot.lane.b32.xlu0 %v942_v39, %s3625_s6  ;;  %v3343_v17 = vpack.c.bf16 %v1141_v15, %v1140_v6 }
 0x1a6   :  { %v3490_v3 = vunpack.i.h.bf16 %v3488_v30  ;;  %v3489_v2 = vunpack.i.l.bf16 %v3488_v30 }
 0x1a7   :  { %3344 = vmatpush3.bf16.msra.mxu1 %v3343_v17 }
 0x1a8   :  { %v1158_v12 = vsel %vm1139_vm6, %v4003_v44, %v3489_v2  ;;  %v1159_v16 = vsel %vm1139_vm6, %v4010_v47, %v3490_v3 }
 0x1a9   :  { %v3493_v18 = vpop.permute.xlu1 %3492  ;;  %v3345_v41 = vpack.c.bf16 %v1159_v16, %v1158_v12 }
 0x1aa   :  { %v3495_v4 = vunpack.i.h.bf16 %v3493_v18  ;;  %v3494_v10 = vunpack.i.l.bf16 %v3493_v18 }
 0x1ab   :  { %3346 = vmatprep.subr.bf16.mxu1 %v3345_v41 }
 0x1ac   :  { %v1142_v1 = vsel %vm1139_vm6, %v4013_v50, %v3494_v10  ;;  %v1143_v39 = vsel %vm1139_vm6, %v4007_v46, %v3495_v4 }
 0x1ad   :  { %v3498_v62 = vpop.permute.xlu1 %3497  ;;  %v3523_v6 = vpop.permute.xlu0 %3522  ;;  %v3347_v15 = vpack.c.bf16 %v1143_v39, %v1142_v1 }
 0x1ae   :  { %v3500_v30 = vunpack.i.h.bf16 %v3498_v62  ;;  %v3499_v17 = vunpack.i.l.bf16 %v3498_v62  ;;  %v3525_v2 = vunpack.i.h.bf16 %v3523_v6  ;;  %v3524_v44 = vunpack.i.l.bf16 %v3523_v6 }
 0x1af   :  { %3348 = vmatpush3.bf16.msra.mxu1 %v3347_v15 }
 0x1b0   :  { %v1160_v3 = vsel %vm1139_vm6, %v4031_v60, %v3524_v44  ;;  %v1161_v12 = vsel %vm1139_vm6, %v4040_v0, %v3525_v2  ;;  %v1144_v16 = vsel %vm1139_vm6, %v4028_v59, %v3499_v17  ;;  %v1145_v18 = vsel %vm1139_vm6, %v4023_v55, %v3500_v30 }
 0x1b1   :  { %v3503_v41 = vpop.permute.xlu1 %3502  ;;  %v3349_v4 = vpack.c.bf16 %v1161_v12, %v1160_v3  ;;  %v3351_v10 = vpack.c.bf16 %v1145_v18, %v1144_v16 }
 0x1b2   :  { %v3505_v1 = vunpack.i.h.bf16 %v3503_v41  ;;  %v3504_v39 = vunpack.i.l.bf16 %v3503_v41 }
 0x1b3   :  { %3350 = vmatprep.subr.bf16.mxu1 %v3349_v4 }
 0x1b4   :  { %3352 = vmatpush3.bf16.msra.mxu1 %v3351_v10  ;;  %v1146_v44 = vsel %vm1139_vm6, %v4046_v5, %v3504_v39  ;;  %v1147_v2 = vsel %vm1139_vm6, %v4037_v63, %v3505_v1 }
 0x1b5   :  { %v3528_v62 = vpop.permute.xlu0 %3527  ;;  %v3508_v17 = vpop.permute.xlu1 %3507  ;;  %v3355_v16 = vpack.c.bf16 %v1147_v2, %v1146_v44 }
 0x1b6   :  { %v3530_v6 = vunpack.i.h.bf16 %v3528_v62  ;;  %v3529_v15 = vunpack.i.l.bf16 %v3528_v62  ;;  %v3510_v18 = vunpack.i.h.bf16 %v3508_v17  ;;  %v3509_v41 = vunpack.i.l.bf16 %v3508_v17 }
 0x1b8   :  { %v1162_v30 = vsel %vm1139_vm6, %v4066_v23, %v3529_v15  ;;  %v1163_v3 = vsel %vm1139_vm6, %v4077_v28, %v3530_v6  ;;  %v1148_v39 = vsel %vm1139_vm6, %v4063_v21, %v3509_v41  ;;  %v1149_v1 = vsel %vm1139_vm6, %v4057_v13, %v3510_v18 }
 0x1b9   :  { %v3353_v12 = vpack.c.bf16 %v1163_v3, %v1162_v30  ;;  %v3513_v0 = vpop.permute.xlu1 %3512  ;;  %v3359_v2 = vpack.c.bf16 %v1149_v1, %v1148_v39 }
 0x1ba   :  { %v3515_v17 = vunpack.i.h.bf16 %v3513_v0  ;;  %v3514_v30 = vunpack.i.l.bf16 %v3513_v0 }
 0x1bb   :  { %3354 = vmatprep.subr.bf16.mxu1 %v3353_v12 }
 0x1bc   :  { %3356 = vmatpush3.bf16.msra.mxu1 %v3355_v16  ;;  %v1150_v41 = vsel %vm1139_vm6, %v4083_v35, %v3514_v30  ;;  %v1151_v18 = vsel %vm1139_vm6, %v4074_v27, %v3515_v17 }
 0x1bd   :  { %v3533_v4 = vpop.permute.xlu0 %3532  ;;  %v3363_v0 = vpack.c.bf16 %v1151_v18, %v1150_v41 }
 0x1be   :  { %v3535_v10 = vunpack.i.h.bf16 %v3533_v4  ;;  %v3534_v62 = vunpack.i.l.bf16 %v3533_v4  ;;  %v3518_v4 = vpop.permute.xlu1 %3517 }
 0x1bf   :  { %v3520_v1 = vunpack.i.h.bf16 %v3518_v4 }
 0x1c0   :  { %v1164_v15 = vsel %vm1139_vm6, %v4103_v48, %v3534_v62  ;;  %v1165_v6 = vsel %vm1139_vm6, %v4114_v52, %v3535_v10 }
 0x1c1   :  { %v3357_v44 = vpack.c.bf16 %v1165_v6, %v1164_v15  ;;  %v3519_v15 = vunpack.i.l.bf16 %v3518_v4  ;;  %v1153_v17 = vsel %vm1139_vm6, %v4094_v40, %v3520_v1 }
 0x1c3   :  { %3358 = vmatprep.subr.bf16.mxu1 %v3357_v44  ;;  %v1152_v30 = vsel %vm1139_vm6, %v4100_v45, %v3519_v15 }
 0x1c4   :  { %3360 = vmatpush3.bf16.msra.mxu1 %v3359_v2  ;;  %v3367_v18 = vpack.c.bf16 %v1153_v17, %v1152_v30 }
 0x1c5   :  { %v3538_v3 = vpop.permute.xlu0 %3537 }
 0x1c6   :  { %v3540_v12 = vunpack.i.h.bf16 %v3538_v3  ;;  %v3539_v16 = vunpack.i.l.bf16 %v3538_v3  ;;  %v3553_v3 = vpop.permute.xlu1 %3552 }
 0x1c7   :  { %v3555_v4 = vunpack.i.h.bf16 %v3553_v3 }
 0x1c8   :  { %v1166_v62 = vsel %vm1139_vm6, %v4132_v24, %v3539_v16  ;;  %v1167_v10 = vsel %vm1139_vm6, %v4137_v9, %v3540_v12 }
 0x1c9   :  { %v3361_v39 = vpack.c.bf16 %v1167_v10, %v1166_v62  ;;  %v3554_v62 = vunpack.i.l.bf16 %v3553_v3  ;;  %v842_v10 = vadd.s32 384, %v4161_v22  ;;  %v5248_v3 = vmov 0 }
 0x1ca   :  { %v5249_v3 = vsel %vm4347_vm12, 4294967295, %v5248_v3 }
 0x1cb   :  { %3362 = vmatprep.subr.bf16.mxu1 %v3361_v39  ;;  %v1154_v1 = vsel %vm1139_vm6, %v4120_v56, %v3554_v62  ;;  %vm847_vm7 = vcmp.ge.s32.totalorder %v842_v10, %v4164_v20  ;;  %vm852_vm8 = vcmp.lt.s32.totalorder %v842_v10, %v4171_v58  ;;  %5250 = vst [vmem:[#allocation31_spill] sm:$0xff] %v5249_v3  ;;  %v5254_v10 = vmov 1.0  }
 0x1cc   :  { %3364 = vmatpush3.bf16.msra.mxu1 %v3363_v0  ;;  %vm856_vm11 = vmand %vm847_vm7, %vm852_vm8 }
 0x1cd   :  { %v3543_v6 = vpop.permute.xlu0 %3542 }
 0x1ce   :  { %v3545_v44 = vunpack.i.h.bf16 %v3543_v6  ;;  %v3544_v2 = vunpack.i.l.bf16 %v3543_v6  ;;  %v1155_v6 = vsel %vm1139_vm6, %v4111_v51, %v3555_v4 }
 0x1cf   :  { %v3371_v17 = vpack.c.bf16 %v1155_v6, %v1154_v1 }
 0x1d0   :  { %v1168_v16 = vsel %vm1139_vm6, %v4145_v14, %v3544_v2  ;;  %v1169_v12 = vsel %vm1139_vm6, %v4149_v29, %v3545_v44 }
 0x1d1   :  { %v3365_v41 = vpack.c.bf16 %v1169_v12, %v1168_v16  ;;  %v5251_v12 = vmov 0.0|0.0  }
 0x1d3   :  { %3366 = vmatprep.subr.bf16.mxu1 %v3365_v41  ;;  %v5252_v41 = vmov 0.0  }
 0x1d4   :  { %3368 = vmatpush3.bf16.msra.mxu1 %v3367_v18  ;;  %v4353_v18 = vsel %vm856_vm11, 1.0, %v5252_v41 }
 0x1d5   :  { %v3548_v39 = vpop.permute.xlu0 %3547  ;;  %5253 = vst [vmem:[#allocation32_spill] sm:$0xff] %v4353_v18 }
 0x1d6   :  { %v3550_v0 = vunpack.i.h.bf16 %v3548_v39  ;;  %v3549_v15 = vunpack.i.l.bf16 %v3548_v39 }
 0x1d8   :  { %v1170_v44 = vsel %vm1139_vm6, %v4158_v43, %v3549_v15  ;;  %v1171_v2 = vsel %vm1139_vm6, %v4167_v53, %v3550_v0 }
 0x1d9   :  { %v3369_v30 = vpack.c.bf16 %v1171_v2, %v1170_v44 }
 0x1db   :  { %3370 = vmatprep.subr.bf16.mxu1 %v3369_v30 }
 0x1dc   :  { %3372 = vmatpush3.bf16.msra.mxu1 %v3371_v17 }
 0x1dd   :  { %v3558_v16 = vpop.permute.xlu0 %3557  ;;  %3373 = vmatprep.subr.bf16.mxu1 %v5251_v12 }
 0x1de   :  { %v3560_v4 = vunpack.i.h.bf16 %v3558_v16  ;;  %v3559_v62 = vunpack.i.l.bf16 %v3558_v16 }
 0x1df   :  { %2742 = vmatmul.mubr.msk.f32.vlgmr.msra.gmra.mrb[0].mxu1 %vm4347_vm12, %v5254_v10 }
 0x1e0   :  { %v1173_v39 = vsel %vm1139_vm6, %v4186_v11, %v3560_v4  ;;  %v1172_v0 = vsel %vm1139_vm6, %v4182_v7, %v3559_v62  ;;  %2743 = vmatprep.mubr.msk.f32.mxu1 %vm1189_vm13, %v4353_v18 }
 0x1e1   :  { %v3374_v15 = vpack.c.bf16 %v1173_v39, %v1172_v0 }
 0x1e3   :  { %3375 = vmatpush1.bf16.msra.mxu1 %v3374_v15 }
 0x1e4   :  { %3376 = vmatprep.subr.bf16.mxu1 %v5251_v12 }
 0x1e5   :  { %v3563_v1 = vpop.permute.xlu1 %3562 }
 0x1e6   :  { %v3565_v6 = vunpack.i.h.bf16 %v3563_v1  ;;  %v3564_v44 = vunpack.i.l.bf16 %v3563_v1 }
 0x1e8   :  { %v1175_v2 = vsel %vm1139_vm6, %v4197_v38, %v3565_v6  ;;  %v1174_v30 = vsel %vm1139_vm6, %v4193_v32, %v3564_v44 }
 0x1e9   :  { %v3377_v17 = vpack.c.bf16 %v1175_v2, %v1174_v30 }
 0x1eb   :  { %3378 = vmatpush1.bf16.msra.mxu1 %v3377_v17 }
 0x1ec   :  { %3379 = vmatprep.subr.bf16.mxu1 %v5251_v12 }
 0x1ed   :  { %v3568_v16 = vpop.permute.xlu0 %3567 }
 0x1ee   :  { %v3570_v4 = vunpack.i.h.bf16 %v3568_v16  ;;  %v3569_v62 = vunpack.i.l.bf16 %v3568_v16 }
 0x1f0   :  { %v1177_v39 = vsel %vm1139_vm6, %v4208_v61, %v3570_v4  ;;  %v1176_v0 = vsel %vm1139_vm6, %v4204_v57, %v3569_v62 }
 0x1f1   :  { %v3380_v15 = vpack.c.bf16 %v1177_v39, %v1176_v0 }
 0x1f3   :  { %3381 = vmatpush1.bf16.msra.mxu1 %v3380_v15 }
 0x1f4   :  { %3382 = vmatprep.subr.bf16.mxu1 %v5251_v12 }
 0x1f5   :  { %v3573_v1 = vpop.permute.xlu1 %3572 }
 0x1f6   :  { %v3575_v6 = vunpack.i.h.bf16 %v3573_v1  ;;  %v3574_v44 = vunpack.i.l.bf16 %v3573_v1 }
 0x1f8   :  { %v1179_v2 = vsel %vm1139_vm6, %v4219_v25, %v3575_v6  ;;  %v1178_v30 = vsel %vm1139_vm6, %v4215_v8, %v3574_v44 }
 0x1f9   :  { %v3383_v17 = vpack.c.bf16 %v1179_v2, %v1178_v30 }
 0x1fb   :  { %3384 = vmatpush1.bf16.msra.mxu1 %v3383_v17 }
 0x1fc   :  { %3385 = vmatprep.subr.bf16.mxu1 %v5251_v12 }
 0x1fd   :  { %v3578_v16 = vpop.permute.xlu0 %3577 }
 0x1fe   :  { %v3580_v4 = vunpack.i.h.bf16 %v3578_v16  ;;  %v3579_v62 = vunpack.i.l.bf16 %v3578_v16 }
 0x200   :  { %v1181_v39 = vsel %vm1139_vm6, %v4230_v26, %v3580_v4  ;;  %v1180_v0 = vsel %vm1139_vm6, %v4226_v49, %v3579_v62 }
 0x201   :  { %v3386_v15 = vpack.c.bf16 %v1181_v39, %v1180_v0  ;;  %v5255_v39 = vld [vmem:[#allocation27_spill] sm:$0xff] }
 0x203   :  { %3387 = vmatpush1.bf16.msra.mxu1 %v3386_v15  ;;  %v5256_v15 = vld [vmem:[#allocation26_spill] sm:$0xff] }
 0x204   :  { %3388 = vmatprep.subr.bf16.mxu1 %v5251_v12 }
 0x205   :  { %v3583_v1 = vpop.permute.xlu1 %3582 }
 0x206   :  { %v3585_v6 = vunpack.i.h.bf16 %v3583_v1  ;;  %v3584_v44 = vunpack.i.l.bf16 %v3583_v1 }
 0x208   :  { %v1183_v2 = vsel %vm1139_vm6, %v4241_v37, %v3585_v6  ;;  %v1182_v30 = vsel %vm1139_vm6, %v4237_v19, %v3584_v44 }
 0x209   :  { %v3389_v17 = vpack.c.bf16 %v1183_v2, %v1182_v30  ;;  %v841_v2 = vadd.s32 256, %v4161_v22 }
 0x20b   :  { %3390 = vmatpush1.bf16.msra.mxu1 %v3389_v17  ;;  %v5257_v17 = vld [vmem:[#allocation28_spill] sm:$0xff]  ;;  %vm846_vm14 = vcmp.ge.s32.totalorder %v841_v2, %v4164_v20  ;;  %vm851_vm15 = vcmp.lt.s32.totalorder %v841_v2, %v4171_v58  ;;  %v5261_v20 = vld [vmem:[#allocation11_spill] sm:$0xff] }
 0x20c   :  { %3391 = vmatprep.subr.bf16.mxu1 %v5251_v12  ;;  %vm4403_vm1 = vmand %vm846_vm14, %vm851_vm15  ;;  %v4416_v58 = vadd.s32 8, %v5261_v20 }
 0x20d   :  { %v3588_v16 = vpop.permute.xlu0 %3587 }
 0x20e   :  { %v3590_v4 = vunpack.i.h.bf16 %v3588_v16  ;;  %v3589_v62 = vunpack.i.l.bf16 %v3588_v16 }
 0x210   :  { %v1185_v0 = vsel %vm1139_vm6, %v5255_v39, %v3590_v4  ;;  %v1184_v26 = vsel %vm1139_vm6, %v5256_v15, %v3589_v62  ;;  %v5258_v4 = vmov 0 }
 0x211   :  { %v3392_v1 = vpack.c.bf16 %v1185_v0, %v1184_v26  ;;  %v5259_v4 = vsel %vm4403_vm1, 4294967295, %v5258_v4  ;;  %v3627_v0 = vmov 1.0|1.0  }
 0x212   :  { %5260 = vst [vmem:[#allocation33_spill] sm:$0xff] %v5259_v4 }
 0x213   :  { %3393 = vmatpush1.bf16.msra.mxu1 %v3392_v1  ;;  %v4425_v1 = vadd.s32 16, %v5261_v20 }
 0x214   :  { %3394 = vmatprep.subr.bf16.mxu1 %v5251_v12 }
 0x215   :  { %v3593_v6 = vpop.permute.xlu1 %3592 }
 0x216   :  { %v3595_v37 = vunpack.i.h.bf16 %v3593_v6  ;;  %v3594_v44 = vunpack.i.l.bf16 %v3593_v6  ;;  %v4428_v6 = vadd.s32 24, %v5261_v20 }
 0x217   :  { %v1089_v26 = vpop.permute.xlu0 %1088 }
 0x218   :  { %v1187_v30 = vsel %vm1139_vm6, %v4263_v42, %v3595_v37  ;;  %v1186_v16 = vsel %vm1139_vm6, %v5257_v17, %v3594_v44  ;;  %v1188_v62 = vsel %vm1139_vm6, %v4274_v54, %v1089_v26 }
 0x219   :  { %v3395_v19 = vpack.c.bf16 %v1187_v30, %v1186_v16 }
 0x21b   :  { %3396 = vmatpush1.bf16.msra.mxu1 %v3395_v19  ;;  %v865_v19 = vmul.u32 4, %v4161_v22 }
 0x21c   :  { %1295 = vmatprep.subr.mxu1 %v5252_v41 }
 0x21d   :  { %vm866_vm2 = vcmp.ge.s32.totalorder %v5261_v20, %v865_v19  ;;  %v870_v37 = vadd.s32 4, %v865_v19  ;;  %vm867_vm3 = vcmp.ge.s32.totalorder %v4416_v58, %v865_v19  ;;  %vm868_vm10 = vcmp.ge.s32.totalorder %v4425_v1, %v865_v19 }
 0x21e   :  { %vm869_vm11 = vcmp.ge.s32.totalorder %v4428_v6, %v865_v19  ;;  %v887_v19 = vmul.u32 4, %v5261_v20 }
 0x21f   :  { %1296 = vmatpush1.msra.mxu1 %v1188_v62  ;;  %vm871_vm4 = vcmp.lt.s32.totalorder %v5261_v20, %v870_v37  ;;  %vm872_vm5 = vcmp.lt.s32.totalorder %v4416_v58, %v870_v37  ;;  %vm873_vm14 = vcmp.lt.s32.totalorder %v4425_v1, %v870_v37  ;;  %vm874_vm15 = vcmp.lt.s32.totalorder %v4428_v6, %v870_v37 }
 0x220   :  { %2744 = vmatmul.mubr.msk.f32.vlgmr.msra.gmra.mrb[2].mxu1 %vm4403_vm1, %v5254_v10  ;;  %3397 = vmatprep.subr.bf16.mxu1 %v5251_v12  ;;  %vm875_vm7 = vmand %vm866_vm2, %vm871_vm4  ;;  %v889_v4 = vadd.s32 4, %v887_v19 }
 0x221   :  { %3164 = vmatprep.mubr.msk.f32.mxu1 %vm3623_vm0, %v5252_v41  ;;  %vm876_vm8 = vmand %vm867_vm3, %vm872_vm5  ;;  %vm1333_vm5 = vcmask 261120  }
 0x222   :  { %vm3398_vm9 = vmpackc.low %vm876_vm8, %vm875_vm7  ;;  %vm888_vm7 = vcmp.ge.s32.totalorder %v4161_v22, %v887_v19  ;;  %vm890_vm8 = vcmp.lt.s32.totalorder %v4161_v22, %v889_v4 }
 0x223   :  { %3399 = vmatpush3.bf16.msk.msra.mxu1 %vm3398_vm9, %v3627_v0  ;;  %vm877_vm2 = vmand %vm868_vm10, %vm873_vm14  ;;  %vm1417_vm10 = vcmask 31744  }
 0x224   :  { %3400 = vmatprep.subr.bf16.mxu1 %v5251_v12  ;;  %vm878_vm3 = vmand %vm869_vm11, %vm874_vm15 }
 0x225   :  { %vm3401_vm4 = vmpackc.low %vm878_vm3, %vm877_vm2 }
 0x226   :  { %vm891_vm9 = vmand %vm888_vm7, %vm890_vm8 }
 0x227   :  { %3402 = vmatpush3.bf16.msk.msra.mxu1 %vm3401_vm4, %v3627_v0 }
 0x228   :  { %3167 = vmatprep.subr.mxu1 %v5252_v41 }
 0x2b2   :  { %v2898_v44 = vpop.f32.mrb[0].mxu1 }
 0x2b3   :  { %v2899_v2 = vpop.f32.mrb[1].mxu1 }
 0x2b4   :  { %v2900_v30 = vadd.f32 %v2899_v2, %v2898_v44  ;;  %v2752_v44 = vld [vmem:[%s5176_s1 + $0x25] ss:$0 sm:$0xff] }
 0x2b5   :  { %1497 = vrot.lane.b32.xlu0 %v2752_v44, %s3625_s6  ;;  %v2753_v44 = vld [vmem:[%s5176_s1 + $0x26] ss:$0 sm:$0xff] }
 0x2f3   :  { %v1329_v16 = vpop.f32.mrb[2].mxu1 }
 0x2f4   :  { %v1330_v26 = vadd.f32 %v2900_v30, %v1329_v16  ;;  %v1331_v62 = vpop.f32.mrb[3].mxu1 }
 0x2f6   :  { %3165 = vmatmul.mubr.msk.f32.vlgmr.msra.gmra.mrb[4].mxu1 %vm1333_vm5, %v1330_v26 }
 0x2f7   :  { %3169 = vmatprep.mubr.msk.f32.mxu1 %vm3623_vm0, %v5252_v41  ;;  %3168 = vmatpush3.msk.msra.mxu1 %vm891_vm9, %v5254_v10 }
 0x2f8   :  { %3172 = vmatprep.subr.mxu1 %v5252_v41 }
 0x3c9   :  { %v1403_v37 = vpop.f32.mrb[4].mxu1 }
 0x3ca   :  { %v1407_v0 = vmul.f32 0.0051020407, %v1403_v37  ;;  %v3166_v54 = vpop.f32.mrb[5].mxu1 }
 0x3cc   :  { %v1408_v42 = vmul.f32 %v1407_v0, %v1407_v0 }
 0x3ce   :  { %1410 = vrot.lane.b32.xlu1 %v1408_v42, %s3628_s7  ;;  %v1498_v42 = vpop.permute.xlu0 %1497 }
 0x440   :  { %v1411_v2 = vpop.permute.xlu1 %1410 }
 0x441   :  { %v1413_v30 = vsub.f32 %v1407_v0, %v1411_v2 }
 0x443   :  { %v1414_v16 = vmax.f32 %v1413_v30, 0.0 }
 0x445   :  { %v1415_v54 = vadd.f32 1e-05, %v1414_v16 }
 0x447   :  { %3596 = vrsqrt.f32 %v1415_v54 }
 0x451   :  { %v3597_v4 = vpop.eup %3596 }
 0x452   :  { %v1418_v26 = vsel %vm1417_vm10, %v1407_v0, %v3597_v4  ;;  %v4455_v0 = vmul.u32 49, %v4161_v22 }
 0x453   :  { %3170 = vmatmul.mubr.msk.f32.vlgmr.msra.gmra.mrb[6].mxu1 %vm1189_vm13, %v1418_v26 }
 0x454   :  { %3174 = vmatprep.mubr.msk.f32.mxu1 %vm3623_vm0, %v5252_v41  ;;  %v4458_v54 = vadd.s32 49, %v4455_v0  ;;  %vm594_vm11 = vcmp.ge.s32.totalorder %v5261_v20, %v4455_v0  ;;  %vm595_vm2 = vcmp.ge.s32.totalorder %v4416_v58, %v4455_v0  ;;  %vm596_vm5 = vcmp.ge.s32.totalorder %v4425_v1, %v4455_v0 }
 0x455   :  { %vm597_vm9 = vcmp.ge.s32.totalorder %v4428_v6, %v4455_v0 }
 0x456   :  { %vm644_vm14 = vcmp.lt.s32.totalorder %v5261_v20, %v4458_v54  ;;  %vm645_vm3 = vcmp.lt.s32.totalorder %v4416_v58, %v4458_v54  ;;  %vm646_vm7 = vcmp.lt.s32.totalorder %v4425_v1, %v4458_v54  ;;  %vm647_vm10 = vcmp.lt.s32.totalorder %v4428_v6, %v4458_v54 }
 0x457   :  { %vm693_vm15 = vmand %vm594_vm11, %vm644_vm14 }
 0x458   :  { %v2683_v22 = vsel %vm693_vm15, 1.0, %v5252_v41  ;;  %vm694_vm4 = vmand %vm595_vm2, %vm645_vm3 }
 0x459   :  { %v2684_v58 = vsel %vm694_vm4, 1.0, %v5252_v41  ;;  %vm695_vm8 = vmand %vm596_vm5, %vm646_vm7 }
 0x45a   :  { %v2685_v1 = vsel %vm695_vm8, 1.0, %v5252_v41  ;;  %vm696_vm11 = vmand %vm597_vm9, %vm647_vm10 }
 0x45b   :  { %v2686_v6 = vsel %vm696_vm11, 1.0, %v5252_v41 }
 0x526   :  { %v1488_v62 = vpop.f32.mrb[6].mxu1 }
 0x527   :  { %v1500_v19 = vmul.f32 %v1498_v42, %v1488_v62  ;;  %v3171_v37 = vpop.f32.mrb[7].mxu1  ;;  %v546_v42 = vadd.s32 32, %v5261_v20 }
 0x529   :  { %1502 = vrot.lane.b32.xlu1 %v1500_v19, %s3629_s10  ;;  %vm598_vm14 = vcmp.ge.s32.totalorder %v546_v42, %v4455_v0  ;;  %vm648_vm15 = vcmp.lt.s32.totalorder %v546_v42, %v4458_v54  ;;  %v548_v19 = vadd.s32 48, %v5261_v20  ;;  %v553_v42 = vadd.s32 88, %v5261_v20 }
 0x52a   :  { %vm697_vm2 = vmand %vm598_vm14, %vm648_vm15 }
 0x52b   :  { %v2687_v37 = vsel %vm697_vm2, 1.0, %v5252_v41  ;;  %vm600_vm7 = vcmp.ge.s32.totalorder %v548_v19, %v4455_v0  ;;  %vm650_vm8 = vcmp.lt.s32.totalorder %v548_v19, %v4458_v54  ;;  %v555_v19 = vadd.s32 104, %v5261_v20 }
 0x52c   :  { %vm699_vm9 = vmand %vm600_vm7, %vm650_vm8 }
 0x59b   :  { %v1503_v2 = vpop.permute.xlu1 %1502 }
 0x59c   :  { %v1505_v30 = vmul.f32 %v1503_v2, %v1488_v62  ;;  %v547_v62 = vadd.s32 40, %v5261_v20 }
 0x59e   :  { %v1510_v16 = vsub.f32 %v2753_v44, %v1505_v30  ;;  %vm599_vm3 = vcmp.ge.s32.totalorder %v547_v62, %v4455_v0  ;;  %vm649_vm4 = vcmp.lt.s32.totalorder %v547_v62, %v4458_v54  ;;  %v549_v44 = vadd.s32 56, %v5261_v20 }
 0x59f   :  { %vm698_vm5 = vmand %vm599_vm3, %vm649_vm4  ;;  %v550_v30 = vadd.s32 64, %v5261_v20  ;;  %v554_v62 = vadd.s32 96, %v5261_v20 }
 0x5a0   :  { %1512 = vrot.lane.b32.xlu0 %v1510_v16, %s3625_s6  ;;  %vm601_vm10 = vcmp.ge.s32.totalorder %v549_v44, %v4455_v0  ;;  %vm651_vm11 = vcmp.lt.s32.totalorder %v549_v44, %v4458_v54  ;;  %v2689_v16 = vsel %vm699_vm9, 1.0, %v5252_v41  ;;  %v556_v44 = vadd.s32 112, %v5261_v20 }
 0x5a1   :  { %vm700_vm14 = vmand %vm601_vm10, %vm651_vm11  ;;  %vm602_vm15 = vcmp.ge.s32.totalorder %v550_v30, %v4455_v0  ;;  %vm652_vm2 = vcmp.lt.s32.totalorder %v550_v30, %v4458_v54  ;;  %vm605_vm11 = vcmp.ge.s32.totalorder %v553_v42, %v4455_v0  ;;  %v557_v30 = vadd.s32 120, %v5261_v20 }
 0x5a2   :  { %vm701_vm3 = vmand %vm602_vm15, %vm652_vm2  ;;  %vm606_vm2 = vcmp.ge.s32.totalorder %v554_v62, %v4455_v0 }
 0x612   :  { %v1513_v4 = vpop.permute.xlu0 %1512 }
 0x613   :  { %v1515_v26 = vsel %vm1139_vm6, %v1503_v2, %v1513_v4  ;;  %v2688_v2 = vsel %vm698_vm5, 1.0, %v5252_v41  ;;  %v551_v4 = vadd.s32 72, %v5261_v20 }
 0x614   :  { %3173 = vmatpush3.msra.mxu1 %v1515_v26  ;;  %v552_v26 = vadd.s32 80, %v5261_v20 }
 0x615   :  { %3175 = vmatmul.mubr.msk.f32.vlgmr.msra.gmra.mrb[8].mxu1 %vm1189_vm13, %v2683_v22  ;;  %v2690_v22 = vsel %vm700_vm14, 1.0, %v5252_v41  ;;  %vm603_vm4 = vcmp.ge.s32.totalorder %v551_v4, %v4455_v0  ;;  %vm653_vm5 = vcmp.lt.s32.totalorder %v551_v4, %v4458_v54  ;;  %vm655_vm14 = vcmp.lt.s32.totalorder %v553_v42, %v4458_v54 }
 0x616   :  { %3177 = vmatprep.mubr.msk.f32.mxu1 %vm3623_vm0, %v5252_v41  ;;  %vm702_vm7 = vmand %vm603_vm4, %vm653_vm5  ;;  %vm604_vm8 = vcmp.ge.s32.totalorder %v552_v26, %v4455_v0  ;;  %vm654_vm9 = vcmp.lt.s32.totalorder %v552_v26, %v4458_v54  ;;  %vm607_vm5 = vcmp.ge.s32.totalorder %v555_v19, %v4455_v0  ;;  %v558_v4 = vadd.s32 128, %v5261_v20 }
 0x617   :  { %vm703_vm10 = vmand %vm604_vm8, %vm654_vm9  ;;  %vm608_vm9 = vcmp.ge.s32.totalorder %v556_v44, %v4455_v0  ;;  %v559_v26 = vadd.s32 136, %v5261_v20  ;;  %v560_v42 = vadd.s32 144, %v5261_v20 }
 0x618   :  { %vm704_vm15 = vmand %vm605_vm11, %vm655_vm14  ;;  %vm609_vm14 = vcmp.ge.s32.totalorder %v557_v30, %v4455_v0 }
 0x619   :  { %3178 = vmatmul.mubr.msk.f32.gmra.mrb[10].mxu1 %vm1189_vm13, %v2684_v58  ;;  %v2691_v58 = vsel %vm701_vm3, 1.0, %v5252_v41  ;;  %vm656_vm3 = vcmp.lt.s32.totalorder %v554_v62, %v4458_v54  ;;  %v561_v62 = vadd.s32 152, %v5261_v20 }
 0x61a   :  { %3180 = vmatprep.mubr.msk.f32.mxu1 %vm3623_vm0, %v5252_v41  ;;  %vm705_vm4 = vmand %vm606_vm2, %vm656_vm3  ;;  %vm610_vm3 = vcmp.ge.s32.totalorder %v558_v4, %v4455_v0 }
 0x61d   :  { %3181 = vmatmul.mubr.msk.f32.gmra.mrb[12].mxu1 %vm1189_vm13, %v2685_v1  ;;  %v2692_v1 = vsel %vm702_vm7, 1.0, %v5252_v41  ;;  %vm657_vm7 = vcmp.lt.s32.totalorder %v555_v19, %v4458_v54  ;;  %v562_v19 = vadd.s32 160, %v5261_v20 }
 0x61e   :  { %3183 = vmatprep.mubr.msk.f32.mxu1 %vm3623_vm0, %v5252_v41  ;;  %vm706_vm8 = vmand %vm607_vm5, %vm657_vm7  ;;  %vm611_vm7 = vcmp.ge.s32.totalorder %v559_v26, %v4455_v0 }
 0x621   :  { %3184 = vmatmul.mubr.msk.f32.gmra.mrb[14].mxu1 %vm1189_vm13, %v2686_v6  ;;  %v2693_v6 = vsel %vm703_vm10, 1.0, %v5252_v41  ;;  %vm658_vm10 = vcmp.lt.s32.totalorder %v556_v44, %v4458_v54  ;;  %v563_v44 = vadd.s32 168, %v5261_v20 }
 0x622   :  { %3186 = vmatprep.mubr.msk.f32.mxu1 %vm3623_vm0, %v5252_v41  ;;  %vm707_vm11 = vmand %vm608_vm9, %vm658_vm10  ;;  %vm612_vm10 = vcmp.ge.s32.totalorder %v560_v42, %v4455_v0 }
 0x625   :  { %3187 = vmatmul.mubr.msk.f32.gmra.mrb[16].mxu1 %vm1189_vm13, %v2687_v37  ;;  %v2694_v37 = vsel %vm704_vm15, 1.0, %v5252_v41  ;;  %vm659_vm15 = vcmp.lt.s32.totalorder %v557_v30, %v4458_v54  ;;  %v564_v30 = vadd.s32 176, %v5261_v20 }
 0x626   :  { %3189 = vmatprep.mubr.msk.f32.mxu1 %vm3623_vm0, %v5252_v41  ;;  %vm708_vm2 = vmand %vm609_vm14, %vm659_vm15  ;;  %vm613_vm15 = vcmp.ge.s32.totalorder %v561_v62, %v4455_v0 }
 0x629   :  { %3190 = vmatmul.mubr.msk.f32.gmra.mrb[18].mxu1 %vm1189_vm13, %v2688_v2  ;;  %v2695_v2 = vsel %vm705_vm4, 1.0, %v5252_v41  ;;  %vm660_vm4 = vcmp.lt.s32.totalorder %v558_v4, %v4458_v54  ;;  %v565_v4 = vadd.s32 184, %v5261_v20 }
 0x62a   :  { %3192 = vmatprep.mubr.msk.f32.mxu1 %vm3623_vm0, %v5252_v41  ;;  %vm709_vm5 = vmand %vm610_vm3, %vm660_vm4  ;;  %vm614_vm4 = vcmp.ge.s32.totalorder %v562_v19, %v4455_v0 }
 0x62d   :  { %3193 = vmatmul.mubr.msk.f32.gmra.mrb[20].mxu1 %vm1189_vm13, %v2689_v16  ;;  %v2696_v16 = vsel %vm706_vm8, 1.0, %v5252_v41  ;;  %vm661_vm8 = vcmp.lt.s32.totalorder %v559_v26, %v4458_v54  ;;  %v566_v26 = vadd.s32 192, %v5261_v20 }
 0x62e   :  { %3195 = vmatprep.mubr.msk.f32.mxu1 %vm3623_vm0, %v5252_v41  ;;  %vm710_vm9 = vmand %vm611_vm7, %vm661_vm8  ;;  %vm615_vm8 = vcmp.ge.s32.totalorder %v563_v44, %v4455_v0 }
 0x631   :  { %3196 = vmatmul.mubr.msk.f32.gmra.mrb[22].mxu1 %vm1189_vm13, %v2690_v22  ;;  %v2697_v22 = vsel %vm707_vm11, 1.0, %v5252_v41  ;;  %vm662_vm11 = vcmp.lt.s32.totalorder %v560_v42, %v4458_v54  ;;  %v567_v42 = vadd.s32 200, %v5261_v20 }
 0x632   :  { %3198 = vmatprep.mubr.msk.f32.mxu1 %vm3623_vm0, %v5252_v41  ;;  %vm711_vm14 = vmand %vm612_vm10, %vm662_vm11  ;;  %vm616_vm11 = vcmp.ge.s32.totalorder %v564_v30, %v4455_v0 }
 0x635   :  { %3199 = vmatmul.mubr.msk.f32.gmra.mrb[24].mxu1 %vm1189_vm13, %v2691_v58  ;;  %v2698_v58 = vsel %vm708_vm2, 1.0, %v5252_v41  ;;  %vm663_vm2 = vcmp.lt.s32.totalorder %v561_v62, %v4458_v54  ;;  %v568_v62 = vadd.s32 208, %v5261_v20 }
 0x636   :  { %3201 = vmatprep.mubr.msk.f32.mxu1 %vm3623_vm0, %v5252_v41  ;;  %vm712_vm3 = vmand %vm613_vm15, %vm663_vm2  ;;  %vm617_vm2 = vcmp.ge.s32.totalorder %v565_v4, %v4455_v0 }
 0x639   :  { %3202 = vmatmul.mubr.msk.f32.gmra.mrb[26].mxu1 %vm1189_vm13, %v2692_v1  ;;  %v2699_v1 = vsel %vm709_vm5, 1.0, %v5252_v41  ;;  %vm664_vm5 = vcmp.lt.s32.totalorder %v562_v19, %v4458_v54  ;;  %v569_v19 = vadd.s32 216, %v5261_v20 }
 0x63a   :  { %3204 = vmatprep.mubr.msk.f32.mxu1 %vm3623_vm0, %v5252_v41  ;;  %vm713_vm7 = vmand %vm614_vm4, %vm664_vm5  ;;  %vm618_vm5 = vcmp.ge.s32.totalorder %v566_v26, %v4455_v0 }
 0x63d   :  { %3205 = vmatmul.mubr.msk.f32.gmra.mrb[28].mxu1 %vm1189_vm13, %v2693_v6  ;;  %v2700_v6 = vsel %vm710_vm9, 1.0, %v5252_v41  ;;  %vm665_vm9 = vcmp.lt.s32.totalorder %v563_v44, %v4458_v54  ;;  %v570_v44 = vadd.s32 224, %v5261_v20 }
 0x63e   :  { %3207 = vmatprep.mubr.msk.f32.mxu1 %vm3623_vm0, %v5252_v41  ;;  %vm714_vm10 = vmand %vm615_vm8, %vm665_vm9  ;;  %vm619_vm9 = vcmp.ge.s32.totalorder %v567_v42, %v4455_v0 }
 0x641   :  { %3208 = vmatmul.mubr.msk.f32.gmra.mrb[30].mxu1 %vm1189_vm13, %v2694_v37  ;;  %v2701_v37 = vsel %vm711_vm14, 1.0, %v5252_v41  ;;  %vm666_vm14 = vcmp.lt.s32.totalorder %v564_v30, %v4458_v54  ;;  %v571_v30 = vadd.s32 232, %v5261_v20 }
 0x642   :  { %3210 = vmatprep.mubr.msk.f32.mxu1 %vm3623_vm0, %v5252_v41  ;;  %vm715_vm15 = vmand %vm616_vm11, %vm666_vm14  ;;  %vm620_vm14 = vcmp.ge.s32.totalorder %v568_v62, %v4455_v0 }
 0x645   :  { %3211 = vmatmul.mubr.msk.f32.gmra.mrb[32].mxu1 %vm1189_vm13, %v2695_v2  ;;  %v2702_v2 = vsel %vm712_vm3, 1.0, %v5252_v41  ;;  %vm667_vm3 = vcmp.lt.s32.totalorder %v565_v4, %v4458_v54  ;;  %v572_v4 = vadd.s32 240, %v5261_v20 }
 0x646   :  { %3213 = vmatprep.mubr.msk.f32.mxu1 %vm3623_vm0, %v5252_v41  ;;  %vm716_vm4 = vmand %vm617_vm2, %vm667_vm3  ;;  %vm621_vm3 = vcmp.ge.s32.totalorder %v569_v19, %v4455_v0 }
 0x649   :  { %3214 = vmatmul.mubr.msk.f32.gmra.mrb[34].mxu1 %vm1189_vm13, %v2696_v16  ;;  %v2703_v16 = vsel %vm713_vm7, 1.0, %v5252_v41  ;;  %vm668_vm7 = vcmp.lt.s32.totalorder %v566_v26, %v4458_v54  ;;  %v573_v26 = vadd.s32 248, %v5261_v20 }
 0x64a   :  { %3216 = vmatprep.mubr.msk.f32.mxu1 %vm3623_vm0, %v5252_v41  ;;  %vm717_vm8 = vmand %vm618_vm5, %vm668_vm7  ;;  %vm622_vm7 = vcmp.ge.s32.totalorder %v570_v44, %v4455_v0 }
 0x64d   :  { %3217 = vmatmul.mubr.msk.f32.gmra.mrb[36].mxu1 %vm1189_vm13, %v2697_v22  ;;  %v2704_v22 = vsel %vm714_vm10, 1.0, %v5252_v41  ;;  %vm669_vm10 = vcmp.lt.s32.totalorder %v567_v42, %v4458_v54  ;;  %v574_v42 = vadd.s32 256, %v5261_v20 }
 0x64e   :  { %3219 = vmatprep.mubr.msk.f32.mxu1 %vm3623_vm0, %v5252_v41  ;;  %vm718_vm11 = vmand %vm619_vm9, %vm669_vm10  ;;  %vm623_vm10 = vcmp.ge.s32.totalorder %v571_v30, %v4455_v0 }
 0x651   :  { %3220 = vmatmul.mubr.msk.f32.gmra.mrb[38].mxu1 %vm1189_vm13, %v2698_v58  ;;  %v2705_v58 = vsel %vm715_vm15, 1.0, %v5252_v41  ;;  %vm670_vm15 = vcmp.lt.s32.totalorder %v568_v62, %v4458_v54  ;;  %v575_v62 = vadd.s32 264, %v5261_v20 }
 0x652   :  { %3222 = vmatprep.mubr.msk.f32.mxu1 %vm3623_vm0, %v5252_v41  ;;  %vm719_vm2 = vmand %vm620_vm14, %vm670_vm15  ;;  %vm624_vm15 = vcmp.ge.s32.totalorder %v572_v4, %v4455_v0 }
 0x655   :  { %3223 = vmatmul.mubr.msk.f32.gmra.mrb[40].mxu1 %vm1189_vm13, %v2699_v1  ;;  %v2706_v1 = vsel %vm716_vm4, 1.0, %v5252_v41  ;;  %vm671_vm4 = vcmp.lt.s32.totalorder %v569_v19, %v4458_v54  ;;  %v576_v19 = vadd.s32 272, %v5261_v20 }
 0x656   :  { %3225 = vmatprep.mubr.msk.f32.mxu1 %vm3623_vm0, %v5252_v41  ;;  %vm720_vm5 = vmand %vm621_vm3, %vm671_vm4  ;;  %vm625_vm4 = vcmp.ge.s32.totalorder %v573_v26, %v4455_v0 }
 0x659   :  { %3226 = vmatmul.mubr.msk.f32.gmra.mrb[42].mxu1 %vm1189_vm13, %v2700_v6  ;;  %v2707_v6 = vsel %vm717_vm8, 1.0, %v5252_v41  ;;  %vm672_vm8 = vcmp.lt.s32.totalorder %v570_v44, %v4458_v54  ;;  %v577_v44 = vadd.s32 280, %v5261_v20 }
 0x65a   :  { %3228 = vmatprep.mubr.msk.f32.mxu1 %vm3623_vm0, %v5252_v41  ;;  %vm721_vm9 = vmand %vm622_vm7, %vm672_vm8  ;;  %vm626_vm8 = vcmp.ge.s32.totalorder %v574_v42, %v4455_v0 }
 0x65d   :  { %3229 = vmatmul.mubr.msk.f32.gmra.mrb[44].mxu1 %vm1189_vm13, %v2701_v37  ;;  %v2708_v37 = vsel %vm718_vm11, 1.0, %v5252_v41  ;;  %vm673_vm11 = vcmp.lt.s32.totalorder %v571_v30, %v4458_v54  ;;  %v578_v30 = vadd.s32 288, %v5261_v20 }
 0x65e   :  { %3231 = vmatprep.mubr.msk.f32.mxu1 %vm3623_vm0, %v5252_v41  ;;  %vm722_vm14 = vmand %vm623_vm10, %vm673_vm11  ;;  %vm627_vm11 = vcmp.ge.s32.totalorder %v575_v62, %v4455_v0 }
 0x661   :  { %3232 = vmatmul.mubr.msk.f32.gmra.mrb[46].mxu1 %vm1189_vm13, %v2702_v2  ;;  %v2709_v2 = vsel %vm719_vm2, 1.0, %v5252_v41  ;;  %vm674_vm2 = vcmp.lt.s32.totalorder %v572_v4, %v4458_v54  ;;  %v579_v4 = vadd.s32 296, %v5261_v20 }
 0x662   :  { %3234 = vmatprep.mubr.msk.f32.mxu1 %vm3623_vm0, %v5252_v41  ;;  %vm723_vm3 = vmand %vm624_vm15, %vm674_vm2  ;;  %vm628_vm2 = vcmp.ge.s32.totalorder %v576_v19, %v4455_v0 }
 0x665   :  { %3235 = vmatmul.mubr.msk.f32.gmra.mrb[48].mxu1 %vm1189_vm13, %v2703_v16  ;;  %v2710_v16 = vsel %vm720_vm5, 1.0, %v5252_v41  ;;  %vm675_vm5 = vcmp.lt.s32.totalorder %v573_v26, %v4458_v54  ;;  %v580_v26 = vadd.s32 304, %v5261_v20 }
 0x666   :  { %3237 = vmatprep.mubr.msk.f32.mxu1 %vm3623_vm0, %v5252_v41  ;;  %vm724_vm7 = vmand %vm625_vm4, %vm675_vm5  ;;  %vm629_vm5 = vcmp.ge.s32.totalorder %v577_v44, %v4455_v0 }
 0x669   :  { %3238 = vmatmul.mubr.msk.f32.gmra.mrb[50].mxu1 %vm1189_vm13, %v2704_v22  ;;  %v2711_v22 = vsel %vm721_vm9, 1.0, %v5252_v41  ;;  %vm676_vm9 = vcmp.lt.s32.totalorder %v574_v42, %v4458_v54  ;;  %v581_v42 = vadd.s32 312, %v5261_v20 }
 0x66a   :  { %3240 = vmatprep.mubr.msk.f32.mxu1 %vm3623_vm0, %v5252_v41  ;;  %vm725_vm10 = vmand %vm626_vm8, %vm676_vm9  ;;  %vm630_vm9 = vcmp.ge.s32.totalorder %v578_v30, %v4455_v0 }
 0x66d   :  { %3241 = vmatmul.mubr.msk.f32.gmra.mrb[52].mxu1 %vm1189_vm13, %v2705_v58  ;;  %v2712_v58 = vsel %vm722_vm14, 1.0, %v5252_v41  ;;  %vm677_vm14 = vcmp.lt.s32.totalorder %v575_v62, %v4458_v54  ;;  %v582_v62 = vadd.s32 320, %v5261_v20 }
 0x66e   :  { %3243 = vmatprep.mubr.msk.f32.mxu1 %vm3623_vm0, %v5252_v41  ;;  %vm726_vm15 = vmand %vm627_vm11, %vm677_vm14  ;;  %vm631_vm14 = vcmp.ge.s32.totalorder %v579_v4, %v4455_v0 }
 0x671   :  { %3244 = vmatmul.mubr.msk.f32.gmra.mrb[54].mxu1 %vm1189_vm13, %v2706_v1  ;;  %v2713_v1 = vsel %vm723_vm3, 1.0, %v5252_v41  ;;  %vm678_vm3 = vcmp.lt.s32.totalorder %v576_v19, %v4458_v54  ;;  %v583_v19 = vadd.s32 328, %v5261_v20 }
 0x672   :  { %3246 = vmatprep.mubr.msk.f32.mxu1 %vm3623_vm0, %v5252_v41  ;;  %vm727_vm4 = vmand %vm628_vm2, %vm678_vm3  ;;  %vm632_vm3 = vcmp.ge.s32.totalorder %v580_v26, %v4455_v0 }
 0x675   :  { %3247 = vmatmul.mubr.msk.f32.gmra.mrb[56].mxu1 %vm1189_vm13, %v2707_v6  ;;  %v2714_v6 = vsel %vm724_vm7, 1.0, %v5252_v41  ;;  %vm679_vm7 = vcmp.lt.s32.totalorder %v577_v44, %v4458_v54  ;;  %v584_v44 = vadd.s32 336, %v5261_v20 }
 0x676   :  { %3249 = vmatprep.mubr.msk.f32.mxu1 %vm3623_vm0, %v5252_v41  ;;  %vm728_vm8 = vmand %vm629_vm5, %vm679_vm7  ;;  %vm633_vm7 = vcmp.ge.s32.totalorder %v581_v42, %v4455_v0 }
 0x679   :  { %3250 = vmatmul.mubr.msk.f32.gmra.mrb[58].mxu1 %vm1189_vm13, %v2708_v37  ;;  %v2715_v37 = vsel %vm725_vm10, 1.0, %v5252_v41  ;;  %vm680_vm10 = vcmp.lt.s32.totalorder %v578_v30, %v4458_v54  ;;  %v585_v30 = vadd.s32 344, %v5261_v20 }
 0x67a   :  { %3252 = vmatprep.mubr.msk.f32.mxu1 %vm3623_vm0, %v5252_v41  ;;  %vm729_vm11 = vmand %vm630_vm9, %vm680_vm10  ;;  %vm634_vm10 = vcmp.ge.s32.totalorder %v582_v62, %v4455_v0 }
 0x67d   :  { %3253 = vmatmul.mubr.msk.f32.gmra.mrb[60].mxu1 %vm1189_vm13, %v2709_v2  ;;  %v2716_v2 = vsel %vm726_vm15, 1.0, %v5252_v41  ;;  %vm681_vm15 = vcmp.lt.s32.totalorder %v579_v4, %v4458_v54  ;;  %v586_v4 = vadd.s32 352, %v5261_v20 }
 0x67e   :  { %3255 = vmatprep.mubr.msk.f32.mxu1 %vm3623_vm0, %v5252_v41  ;;  %vm730_vm2 = vmand %vm631_vm14, %vm681_vm15  ;;  %vm635_vm15 = vcmp.ge.s32.totalorder %v583_v19, %v4455_v0 }
 0x681   :  { %3256 = vmatmul.mubr.msk.f32.gmra.mrb[62].mxu1 %vm1189_vm13, %v2710_v16  ;;  %v2717_v16 = vsel %vm727_vm4, 1.0, %v5252_v41  ;;  %vm682_vm4 = vcmp.lt.s32.totalorder %v580_v26, %v4458_v54  ;;  %v587_v26 = vadd.s32 360, %v5261_v20 }
 0x682   :  { %3258 = vmatprep.mubr.msk.f32.mxu1 %vm3623_vm0, %v5252_v41  ;;  %vm731_vm5 = vmand %vm632_vm3, %vm682_vm4  ;;  %vm636_vm4 = vcmp.ge.s32.totalorder %v584_v44, %v4455_v0 }
 0x685   :  { %3259 = vmatmul.mubr.msk.f32.gmra.mrb[64].mxu1 %vm1189_vm13, %v2711_v22  ;;  %v2718_v22 = vsel %vm728_vm8, 1.0, %v5252_v41  ;;  %vm683_vm8 = vcmp.lt.s32.totalorder %v581_v42, %v4458_v54  ;;  %v588_v42 = vadd.s32 368, %v5261_v20 }
 0x686   :  { %3261 = vmatprep.mubr.msk.f32.mxu1 %vm3623_vm0, %v5252_v41  ;;  %vm732_vm9 = vmand %vm633_vm7, %vm683_vm8  ;;  %vm637_vm8 = vcmp.ge.s32.totalorder %v585_v30, %v4455_v0 }
 0x689   :  { %3262 = vmatmul.mubr.msk.f32.gmra.mrb[66].mxu1 %vm1189_vm13, %v2712_v58  ;;  %v2719_v58 = vsel %vm729_vm11, 1.0, %v5252_v41  ;;  %vm684_vm11 = vcmp.lt.s32.totalorder %v582_v62, %v4458_v54  ;;  %v589_v62 = vadd.s32 376, %v5261_v20 }
 0x68a   :  { %3264 = vmatprep.mubr.msk.f32.mxu1 %vm3623_vm0, %v5252_v41  ;;  %vm733_vm14 = vmand %vm634_vm10, %vm684_vm11  ;;  %vm638_vm11 = vcmp.ge.s32.totalorder %v586_v4, %v4455_v0 }
 0x68d   :  { %3265 = vmatmul.mubr.msk.f32.gmra.mrb[68].mxu1 %vm1189_vm13, %v2713_v1  ;;  %v2720_v1 = vsel %vm730_vm2, 1.0, %v5252_v41  ;;  %vm685_vm2 = vcmp.lt.s32.totalorder %v583_v19, %v4458_v54  ;;  %v590_v19 = vadd.s32 384, %v5261_v20 }
 0x68e   :  { %3267 = vmatprep.mubr.msk.f32.mxu1 %vm3623_vm0, %v5252_v41  ;;  %vm734_vm3 = vmand %vm635_vm15, %vm685_vm2  ;;  %vm639_vm2 = vcmp.ge.s32.totalorder %v587_v26, %v4455_v0 }
 0x691   :  { %3268 = vmatmul.mubr.msk.f32.gmra.mrb[70].mxu1 %vm1189_vm13, %v2714_v6  ;;  %v2721_v6 = vsel %vm731_vm5, 1.0, %v5252_v41  ;;  %vm686_vm5 = vcmp.lt.s32.totalorder %v584_v44, %v4458_v54 }
 0x692   :  { %3270 = vmatprep.mubr.msk.f32.mxu1 %vm3623_vm0, %v5252_v41  ;;  %vm735_vm7 = vmand %vm636_vm4, %vm686_vm5  ;;  %vm640_vm5 = vcmp.ge.s32.totalorder %v588_v42, %v4455_v0 }
 0x695   :  { %3271 = vmatmul.mubr.msk.f32.gmra.mrb[72].mxu1 %vm1189_vm13, %v2715_v37  ;;  %v2722_v37 = vsel %vm732_vm9, 1.0, %v5252_v41  ;;  %vm687_vm9 = vcmp.lt.s32.totalorder %v585_v30, %v4458_v54 }
 0x696   :  { %3273 = vmatprep.mubr.msk.f32.mxu1 %vm3623_vm0, %v5252_v41  ;;  %vm736_vm10 = vmand %vm637_vm8, %vm687_vm9  ;;  %vm641_vm9 = vcmp.ge.s32.totalorder %v589_v62, %v4455_v0 }
 0x699   :  { %3274 = vmatmul.mubr.msk.f32.gmra.mrb[74].mxu1 %vm1189_vm13, %v2716_v2  ;;  %v2723_v2 = vsel %vm733_vm14, 1.0, %v5252_v41  ;;  %vm688_vm14 = vcmp.lt.s32.totalorder %v586_v4, %v4458_v54 }
 0x69a   :  { %3276 = vmatprep.mubr.msk.f32.mxu1 %vm3623_vm0, %v5252_v41  ;;  %vm737_vm15 = vmand %vm638_vm11, %vm688_vm14  ;;  %vm642_vm14 = vcmp.ge.s32.totalorder %v590_v19, %v4455_v0 }
 0x69d   :  { %3277 = vmatmul.mubr.msk.f32.gmra.mrb[76].mxu1 %vm1189_vm13, %v2717_v16  ;;  %v2724_v16 = vsel %vm734_vm3, 1.0, %v5252_v41  ;;  %vm689_vm3 = vcmp.lt.s32.totalorder %v587_v26, %v4458_v54 }
 0x69e   :  { %3279 = vmatprep.mubr.msk.f32.mxu1 %vm3623_vm0, %v5252_v41  ;;  %vm738_vm4 = vmand %vm639_vm2, %vm689_vm3 }
 0x6a1   :  { %3280 = vmatmul.mubr.msk.f32.gmra.mrb[78].mxu1 %vm1189_vm13, %v2718_v22  ;;  %v2725_v22 = vsel %vm735_vm7, 1.0, %v5252_v41  ;;  %vm690_vm7 = vcmp.lt.s32.totalorder %v588_v42, %v4458_v54 }
 0x6a2   :  { %3282 = vmatprep.mubr.msk.f32.mxu1 %vm3623_vm0, %v5252_v41  ;;  %vm739_vm8 = vmand %vm640_vm5, %vm690_vm7 }
 0x6a5   :  { %3283 = vmatmul.mubr.msk.f32.gmra.mrb[80].mxu1 %vm1189_vm13, %v2719_v58  ;;  %v2726_v58 = vsel %vm736_vm10, 1.0, %v5252_v41  ;;  %vm691_vm10 = vcmp.lt.s32.totalorder %v589_v62, %v4458_v54 }
 0x6a6   :  { %3285 = vmatprep.mubr.msk.f32.mxu1 %vm3623_vm0, %v5252_v41  ;;  %vm740_vm11 = vmand %vm641_vm9, %vm691_vm10 }
 0x6a7   :  { %v2730_v44 = vsel %vm740_vm11, 1.0, %v5252_v41 }
 0x6a9   :  { %3286 = vmatmul.mubr.msk.f32.gmra.mrb[82].mxu1 %vm1189_vm13, %v2720_v1  ;;  %v2727_v1 = vsel %vm737_vm15, 1.0, %v5252_v41  ;;  %vm692_vm15 = vcmp.lt.s32.totalorder %v590_v19, %v4458_v54 }
 0x6aa   :  { %3288 = vmatprep.mubr.msk.f32.mxu1 %vm3623_vm0, %v5252_v41  ;;  %vm741_vm2 = vmand %vm642_vm14, %vm692_vm15 }
 0x6ab   :  { %v2731_v20 = vsel %vm741_vm2, 1.0, %v5252_v41 }
 0x6ad   :  { %3289 = vmatmul.mubr.msk.f32.gmra.mrb[84].mxu1 %vm1189_vm13, %v2721_v6  ;;  %v2728_v6 = vsel %vm738_vm4, 1.0, %v5252_v41 }
 0x6ae   :  { %3291 = vmatprep.mubr.msk.f32.mxu1 %vm3623_vm0, %v5252_v41 }
 0x6b1   :  { %3292 = vmatmul.mubr.msk.f32.gmra.mrb[86].mxu1 %vm1189_vm13, %v2722_v37  ;;  %v2729_v37 = vsel %vm739_vm8, 1.0, %v5252_v41 }
 0x6b2   :  { %3294 = vmatprep.mubr.msk.f32.mxu1 %vm3623_vm0, %v5252_v41 }
 0x6b5   :  { %3295 = vmatmul.mubr.msk.f32.gmra.mrb[88].mxu1 %vm1189_vm13, %v2723_v2 }
 0x6b6   :  { %3297 = vmatprep.mubr.msk.f32.mxu1 %vm3623_vm0, %v5252_v41 }
 0x6b9   :  { %3298 = vmatmul.mubr.msk.f32.gmra.mrb[90].mxu1 %vm1189_vm13, %v2724_v16 }
 0x6ba   :  { %3300 = vmatprep.mubr.msk.f32.mxu1 %vm3623_vm0, %v5252_v41 }
 0x6bd   :  { %3301 = vmatmul.mubr.msk.f32.gmra.mrb[92].mxu1 %vm1189_vm13, %v2725_v22 }
 0x6be   :  { %3303 = vmatprep.mubr.msk.f32.mxu1 %vm3623_vm0, %v5252_v41 }
 0x6c1   :  { %3304 = vmatmul.mubr.msk.f32.gmra.mrb[94].mxu1 %vm1189_vm13, %v2726_v58 }
 0x6c2   :  { %3306 = vmatprep.mubr.msk.f32.mxu1 %vm3623_vm0, %v5252_v41 }
 0x6c5   :  { %3307 = vmatmul.mubr.msk.f32.gmra.mrb[96].mxu1 %vm1189_vm13, %v2727_v1 }
 0x6c6   :  { %3309 = vmatprep.mubr.msk.f32.mxu1 %vm3623_vm0, %v5252_v41 }
 0x6c9   :  { %3310 = vmatmul.mubr.msk.f32.gmra.mrb[98].mxu1 %vm1189_vm13, %v2728_v6 }
 0x6ca   :  { %3312 = vmatprep.mubr.msk.f32.mxu1 %vm3623_vm0, %v5252_v41 }
 0x6cd   :  { %3313 = vmatmul.mubr.msk.f32.gmra.mrb[100].mxu1 %vm1189_vm13, %v2729_v37 }
 0x6ce   :  { %3315 = vmatprep.mubr.msk.f32.mxu1 %vm3623_vm0, %v5252_v41 }
 0x6d1   :  { %3316 = vmatmul.mubr.msk.f32.gmra.mrb[102].mxu1 %vm1189_vm13, %v2730_v44 }
 0x6d2   :  { %3318 = vmatprep.mubr.msk.f32.mxu1 %vm3623_vm0, %v5252_v41 }
 0x6d5   :  { %3319 = vmatmul.mubr.msk.f32.gmra.mrb[104].mxu1 %vm1189_vm13, %v2731_v20 }
 0x6e8   :  { %v4806_v0 = vpop.f32.mrb[8].mxu1 }
 0x6e9   :  { %2071 = vrot.lane.b32.xlu1 %v4806_v0, %s3629_s10  ;;  %v3176_v54 = vpop.f32.mrb[9].mxu1 }
 0x6ec   :  { %v4810_v2 = vpop.f32.mrb[10].mxu1 }
 0x6ed   :  { %2073 = vrot.lane.b32.xlu0 %v4810_v2, %s3629_s10  ;;  %v3179_v30 = vpop.f32.mrb[11].mxu1  ;;  %v1974_v56 = vmul.f32 %v4810_v2, %v3986_v33 }
 0x6f0   :  { %v4814_v16 = vpop.f32.mrb[12].mxu1 }
 0x6f1   :  { %2075 = vrot.lane.b32.xlu1 %v4814_v16, %s3629_s10  ;;  %v3182_v4 = vpop.f32.mrb[13].mxu1  ;;  %v1975_v14 = vmul.f32 %v4814_v16, %v4013_v50 }
 0x6f4   :  { %v4818_v22 = vpop.f32.mrb[14].mxu1 }
 0x6f5   :  { %2077 = vrot.lane.b32.xlu0 %v4818_v22, %s3629_s10  ;;  %v3185_v26 = vpop.f32.mrb[15].mxu1 }
 0x6f8   :  { %v4822_v58 = vpop.f32.mrb[16].mxu1 }
 0x6f9   :  { %2079 = vrot.lane.b32.xlu1 %v4822_v58, %s3629_s10  ;;  %v3188_v42 = vpop.f32.mrb[17].mxu1 }
 0x6fc   :  { %v4826_v1 = vpop.f32.mrb[18].mxu1 }
 0x6fd   :  { %2081 = vrot.lane.b32.xlu0 %v4826_v1, %s3629_s10  ;;  %v3191_v62 = vpop.f32.mrb[19].mxu1 }
 0x700   :  { %v4830_v6 = vpop.f32.mrb[20].mxu1 }
 0x701   :  { %2083 = vrot.lane.b32.xlu1 %v4830_v6, %s3629_s10  ;;  %v3194_v19 = vpop.f32.mrb[21].mxu1 }
 0x704   :  { %v4834_v37 = vpop.f32.mrb[22].mxu1 }
 0x705   :  { %2085 = vrot.lane.b32.xlu0 %v4834_v37, %s3629_s10  ;;  %v3197_v44 = vpop.f32.mrb[23].mxu1 }
 0x708   :  { %v4838_v20 = vpop.f32.mrb[24].mxu1 }
 0x709   :  { %2087 = vrot.lane.b32.xlu1 %v4838_v20, %s3629_s10  ;;  %v3200_v54 = vpop.f32.mrb[25].mxu1 }
 0x70c   :  { %v4842_v30 = vpop.f32.mrb[26].mxu1 }
 0x70d   :  { %2089 = vrot.lane.b32.xlu0 %v4842_v30, %s3629_s10  ;;  %v3203_v4 = vpop.f32.mrb[27].mxu1 }
 0x710   :  { %v4846_v26 = vpop.f32.mrb[28].mxu1 }
 0x711   :  { %2091 = vrot.lane.b32.xlu1 %v4846_v26, %s3629_s10  ;;  %v3206_v42 = vpop.f32.mrb[29].mxu1 }
 0x714   :  { %v4850_v62 = vpop.f32.mrb[30].mxu1 }
 0x715   :  { %2093 = vrot.lane.b32.xlu0 %v4850_v62, %s3629_s10  ;;  %v3209_v19 = vpop.f32.mrb[31].mxu1 }
 0x718   :  { %v4854_v44 = vpop.f32.mrb[32].mxu1 }
 0x719   :  { %2095 = vrot.lane.b32.xlu1 %v4854_v44, %s3629_s10  ;;  %v3212_v54 = vpop.f32.mrb[33].mxu1 }
 0x71c   :  { %v4858_v41 = vpop.f32.mrb[34].mxu1 }
 0x71d   :  { %2097 = vrot.lane.b32.xlu0 %v4858_v41, %s3629_s10  ;;  %v3215_v4 = vpop.f32.mrb[35].mxu1 }
 0x720   :  { %v4862_v17 = vpop.f32.mrb[36].mxu1 }
 0x721   :  { %v3218_v42 = vpop.f32.mrb[37].mxu1 }
 0x724   :  { %v4864_v39 = vpop.f32.mrb[38].mxu1 }
 0x725   :  { %v3221_v15 = vpop.f32.mrb[39].mxu1 }
 0x728   :  { %v4866_v49 = vpop.f32.mrb[40].mxu1 }
 0x729   :  { %2103 = vrot.lane.b32.xlu1 %v4866_v49, %s3629_s10  ;;  %v3224_v19 = vpop.f32.mrb[41].mxu1 }
 0x72c   :  { %v4870_v25 = vpop.f32.mrb[42].mxu1 }
 0x72d   :  { %2105 = vrot.lane.b32.xlu0 %v4870_v25, %s3629_s10  ;;  %v3227_v54 = vpop.f32.mrb[43].mxu1 }
 0x730   :  { %v4874_v8 = vpop.f32.mrb[44].mxu1 }
 0x731   :  { %2107 = vrot.lane.b32.xlu1 %v4874_v8, %s3629_s10  ;;  %v3230_v4 = vpop.f32.mrb[45].mxu1 }
 0x734   :  { %v4878_v42 = vpop.f32.mrb[46].mxu1 }
 0x735   :  { %2109 = vrot.lane.b32.xlu0 %v4878_v42, %s3629_s10  ;;  %v3233_v15 = vpop.f32.mrb[47].mxu1 }
 0x738   :  { %v4882_v61 = vpop.f32.mrb[48].mxu1 }
 0x739   :  { %2111 = vrot.lane.b32.xlu1 %v4882_v61, %s3629_s10  ;;  %v3236_v19 = vpop.f32.mrb[49].mxu1 }
 0x73c   :  { %v4886_v57 = vpop.f32.mrb[50].mxu1 }
 0x73d   :  { %2113 = vrot.lane.b32.xlu0 %v4886_v57, %s3629_s10  ;;  %v3239_v54 = vpop.f32.mrb[51].mxu1 }
 0x740   :  { %v4890_v18 = vpop.f32.mrb[52].mxu1 }
 0x741   :  { %2115 = vrot.lane.b32.xlu1 %v4890_v18, %s3629_s10  ;;  %v3242_v4 = vpop.f32.mrb[53].mxu1 }
 0x744   :  { %v4894_v38 = vpop.f32.mrb[54].mxu1 }
 0x745   :  { %2117 = vrot.lane.b32.xlu0 %v4894_v38, %s3629_s10  ;;  %v3245_v15 = vpop.f32.mrb[55].mxu1 }
 0x748   :  { %v4898_v3 = vpop.f32.mrb[56].mxu1 }
 0x749   :  { %2119 = vrot.lane.b32.xlu1 %v4898_v3, %s3629_s10  ;;  %v3248_v19 = vpop.f32.mrb[57].mxu1 }
 0x74c   :  { %v4902_v10 = vpop.f32.mrb[58].mxu1 }
 0x74d   :  { %2121 = vrot.lane.b32.xlu0 %v4902_v10, %s3629_s10  ;;  %v3251_v54 = vpop.f32.mrb[59].mxu1 }
 0x74e   :  { %v1973_v54 = vmul.f32 %v4806_v0, %v3992_v36 }
 0x750   :  { %v4906_v32 = vpop.f32.mrb[60].mxu1 }
 0x751   :  { %2123 = vrot.lane.b32.xlu1 %v4906_v32, %s3629_s10  ;;  %v3254_v4 = vpop.f32.mrb[61].mxu1 }
 0x754   :  { %v4910_v12 = vpop.f32.mrb[62].mxu1 }
 0x755   :  { %2125 = vrot.lane.b32.xlu0 %v4910_v12, %s3629_s10  ;;  %v3257_v15 = vpop.f32.mrb[63].mxu1 }
 0x758   :  { %v4914_v11 = vpop.f32.mrb[64].mxu1 }
 0x759   :  { %5262 = vst [vmem:[#allocation11_spill] sm:$0xff] %v4914_v11  ;;  %2127 = vrot.lane.b32.xlu1 %v4914_v11, %s3629_s10  ;;  %v3260_v19 = vpop.f32.mrb[65].mxu1 }
 0x75b   :  { %v2072_v7 = vpop.permute.xlu1 %2071 }
 0x75c   :  { %v4920_v51 = vpop.f32.mrb[66].mxu1  ;;  %v2218_v15 = vadd.f32 %v2072_v7, %v1973_v54 }
 0x75d   :  { %5263 = vst [vmem:[#allocation34_spill] sm:$0xff] %v4920_v51  ;;  %2129 = vrot.lane.b32.xlu0 %v4920_v51, %s3629_s10  ;;  %v3263_v4 = vpop.f32.mrb[67].mxu1 }
 0x75e   :  { %v2267_v11 = vmax.f32 %v2218_v15, 0.0  ;;  %v1977_v15 = vmul.f32 %v4822_v58, %v4028_v59 }
 0x75f   :  { %v2074_v53 = vpop.permute.xlu0 %2073 }
 0x760   :  { %v2219_v43 = vadd.f32 %v2074_v53, %v1974_v56  ;;  %v4926_v29 = vpop.f32.mrb[68].mxu1  ;;  %v1976_v56 = vmul.f32 %v4818_v22, %v4007_v46  ;;  %v1978_v22 = vmul.f32 %v4826_v1, %v4023_v55  ;;  %v1980_v1 = vmul.f32 %v4834_v37, %v4037_v63 }
 0x761   :  { %2131 = vrot.lane.b32.xlu1 %v4926_v29, %s3629_s10  ;;  %v3266_v19 = vpop.f32.mrb[69].mxu1  ;;  %v1982_v37 = vmul.f32 %v4842_v30, %v4057_v13  ;;  %v1984_v30 = vmul.f32 %v4850_v62, %v4074_v27  ;;  %v1986_v62 = vmul.f32 %v4858_v41, %v4094_v40 }
 0x762   :  { %v2268_v36 = vmax.f32 %v2219_v43, 0.0 }
 0x763   :  { %v2076_v0 = vpop.permute.xlu1 %2075 }
 0x764   :  { %v4932_v51 = vpack.c.bf16 %v2268_v36, %v2267_v11  ;;  %v4934_v4 = vpop.f32.mrb[70].mxu1  ;;  %v2220_v53 = vadd.f32 %v2076_v0, %v1975_v14 }
 0x765   :  { %2099 = vrot.lane.b32.xlu1 %v4862_v17, %s3629_s10  ;;  %2133 = vrot.lane.b32.xlu0 %v4934_v4, %s3629_s10  ;;  %v3269_v33 = vpop.f32.mrb[71].mxu1 }
 0x766   :  { %v2269_v11 = vmax.f32 %v2220_v53, 0.0 }
 0x767   :  { %v2078_v43 = vpop.permute.xlu0 %2077 }
 0x768   :  { %v2221_v7 = vadd.f32 %v2078_v43, %v1976_v56  ;;  %v4942_v2 = vpop.f32.mrb[72].mxu1 }
 0x769   :  { %2101 = vrot.lane.b32.xlu0 %v4864_v39, %s3629_s10  ;;  %2135 = vrot.lane.b32.xlu1 %v4942_v2, %s3629_s10  ;;  %v3272_v50 = vpop.f32.mrb[73].mxu1 }
 0x76a   :  { %v2270_v16 = vmax.f32 %v2221_v7, 0.0  ;;  %v1979_v7 = vmul.f32 %v4830_v6, %v4046_v5 }
 0x76b   :  { %v2080_v54 = vpop.permute.xlu1 %2079 }
 0x76c   :  { %v4950_v19 = vpack.c.bf16 %v2270_v16, %v2269_v11  ;;  %v4952_v46 = vpop.f32.mrb[74].mxu1  ;;  %v2222_v36 = vadd.f32 %v2080_v54, %v1977_v15 }
 0x76d   :  { %2137 = vrot.lane.b32.xlu0 %v4952_v46, %s3629_s10  ;;  %v3275_v14 = vpop.f32.mrb[75].mxu1 }
 0x76e   :  { %v2271_v58 = vmax.f32 %v2222_v36, 0.0 }
 0x76f   :  { %v2082_v0 = vpop.permute.xlu0 %2081 }
 0x770   :  { %v2223_v33 = vadd.f32 %v2082_v0, %v1978_v22  ;;  %v4958_v56 = vpop.f32.mrb[76].mxu1  ;;  %v1981_v0 = vmul.f32 %v4838_v20, %v4063_v21 }
 0x771   :  { %2139 = vrot.lane.b32.xlu1 %v4958_v56, %s3629_s10  ;;  %v3278_v59 = vpop.f32.mrb[77].mxu1 }
 0x772   :  { %v2272_v53 = vmax.f32 %v2223_v33, 0.0 }
 0x773   :  { %v2084_v43 = vpop.permute.xlu1 %2083 }
 0x774   :  { %v4964_v50 = vpack.c.bf16 %v2272_v53, %v2271_v58  ;;  %v4966_v11 = vpop.f32.mrb[78].mxu1  ;;  %v2224_v16 = vadd.f32 %v2084_v43, %v1979_v7 }
 0x775   :  { %2141 = vrot.lane.b32.xlu0 %v4966_v11, %s3629_s10  ;;  %v3281_v55 = vpop.f32.mrb[79].mxu1 }
 0x776   :  { %v2273_v6 = vmax.f32 %v2224_v16, 0.0  ;;  %v1983_v16 = vmul.f32 %v4846_v26, %v4083_v35 }
 0x777   :  { %v2086_v54 = vpop.permute.xlu0 %2085 }
 0x778   :  { %v2225_v15 = vadd.f32 %v2086_v54, %v1980_v1  ;;  %v4972_v14 = vpop.f32.mrb[80].mxu1 }
 0x779   :  { %2143 = vrot.lane.b32.xlu1 %v4972_v14, %s3629_s10  ;;  %v3284_v5 = vpop.f32.mrb[81].mxu1 }
 0x77a   :  { %v2274_v22 = vmax.f32 %v2225_v15, 0.0 }
 0x77b   :  { %v2088_v36 = vpop.permute.xlu1 %2087 }
 0x77c   :  { %v4978_v33 = vpack.c.bf16 %v2274_v22, %v2273_v6  ;;  %v4980_v59 = vpop.f32.mrb[82].mxu1  ;;  %v2226_v58 = vadd.f32 %v2088_v36, %v1981_v0 }
 0x77d   :  { %2145 = vrot.lane.b32.xlu0 %v4980_v59, %s3629_s10  ;;  %v3287_v63 = vpop.f32.mrb[83].mxu1 }
 0x77e   :  { %v2275_v20 = vmax.f32 %v2226_v58, 0.0 }
 0x77f   :  { %v2090_v53 = vpop.permute.xlu0 %2089 }
 0x780   :  { %v2227_v43 = vadd.f32 %v2090_v53, %v1982_v37  ;;  %v4986_v7 = vpop.f32.mrb[84].mxu1  ;;  %v1985_v37 = vmul.f32 %v4854_v44, %v4100_v45 }
 0x781   :  { %2147 = vrot.lane.b32.xlu1 %v4986_v7, %s3629_s10  ;;  %v3290_v21 = vpop.f32.mrb[85].mxu1 }
 0x782   :  { %v2276_v55 = vmax.f32 %v2227_v43, 0.0 }
 0x783   :  { %v2092_v1 = vpop.permute.xlu1 %2091 }
 0x784   :  { %v4992_v54 = vpack.c.bf16 %v2276_v55, %v2275_v20  ;;  %v4994_v15 = vpop.f32.mrb[86].mxu1  ;;  %v2228_v5 = vadd.f32 %v2092_v1, %v1983_v16 }
 0x785   :  { %2149 = vrot.lane.b32.xlu0 %v4994_v15, %s3629_s10  ;;  %v3293_v13 = vpop.f32.mrb[87].mxu1 }
 0x786   :  { %v2277_v26 = vmax.f32 %v2228_v5, 0.0 }
 0x787   :  { %v2094_v6 = vpop.permute.xlu0 %2093 }
 0x788   :  { %v2229_v22 = vadd.f32 %v2094_v6, %v1984_v30  ;;  %v5000_v36 = vpop.f32.mrb[88].mxu1  ;;  %v1989_v6 = vmul.f32 %v4866_v49, %v3983_v31 }
 0x789   :  { %2151 = vrot.lane.b32.xlu1 %v5000_v36, %s3629_s10  ;;  %v3296_v35 = vpop.f32.mrb[89].mxu1 }
 0x78a   :  { %v2278_v0 = vmax.f32 %v2229_v22, 0.0 }
 0x78b   :  { %v2096_v63 = vpop.permute.xlu1 %2095 }
 0x78c   :  { %v5006_v58 = vpack.c.bf16 %v2278_v0, %v2277_v26  ;;  %v5008_v53 = vpop.f32.mrb[90].mxu1  ;;  %v2230_v43 = vadd.f32 %v2096_v63, %v1985_v37  ;;  %v1990_v26 = vmul.f32 %v4870_v25, %v3989_v34  ;;  %v1992_v25 = vmul.f32 %v4878_v42, %v4010_v47  ;;  %v5265_v47 = vld [vmem:[#allocation6_spill] sm:$0xff] }
 0x78d   :  { %2153 = vrot.lane.b32.xlu0 %v5008_v53, %s3629_s10  ;;  %v3299_v27 = vpop.f32.mrb[91].mxu1  ;;  %v1994_v42 = vmul.f32 %v4886_v57, %v5265_v47  ;;  %v5267_v47 = vld [vmem:[#allocation11_spill] sm:$0xff] }
 0x78e   :  { %v2279_v44 = vmax.f32 %v2230_v43, 0.0 }
 0x78f   :  { %v2098_v21 = vpop.permute.xlu0 %2097 }
 0x790   :  { %v2231_v20 = vadd.f32 %v2098_v21, %v1986_v62  ;;  %v5014_v55 = vpop.f32.mrb[92].mxu1  ;;  %v5264_v21 = vld [vmem:[#allocation5_spill] sm:$0xff] }
 0x791   :  { %2155 = vrot.lane.b32.xlu1 %v5014_v55, %s3629_s10  ;;  %v3302_v45 = vpop.f32.mrb[93].mxu1 }
 0x792   :  { %v2280_v1 = vmax.f32 %v2231_v20, 0.0  ;;  %v1991_v20 = vmul.f32 %v4874_v8, %v5264_v21  ;;  %v1995_v21 = vmul.f32 %v4890_v18, %v4066_v23  ;;  %v1998_v23 = vmul.f32 %v4902_v10, %v4114_v52 }
 0x794   :  { %v5018_v16 = vpack.c.bf16 %v2280_v1, %v2279_v44  ;;  %v5020_v13 = vpop.f32.mrb[94].mxu1 }
 0x795   :  { %2157 = vrot.lane.b32.xlu0 %v5020_v13, %s3629_s10  ;;  %v3305_v30 = vpop.f32.mrb[95].mxu1 }
 0x798   :  { %v5024_v40 = vpop.f32.mrb[96].mxu1 }
 0x799   :  { %2159 = vrot.lane.b32.xlu1 %v5024_v40, %s3629_s10  ;;  %v3308_v41 = vpop.f32.mrb[97].mxu1 }
 0x79b   :  { %v2104_v5 = vpop.permute.xlu1 %2103 }
 0x79c   :  { %v5030_v22 = vpop.f32.mrb[98].mxu1  ;;  %v2234_v0 = vadd.f32 %v2104_v5, %v1989_v6 }
 0x79d   :  { %2161 = vrot.lane.b32.xlu0 %v5030_v22, %s3629_s10  ;;  %v3311_v35 = vpop.f32.mrb[99].mxu1 }
 0x79e   :  { %v2283_v43 = vmax.f32 %v2234_v0, 0.0  ;;  %v1993_v0 = vmul.f32 %v4882_v61, %v4031_v60  ;;  %v1996_v60 = vmul.f32 %v4894_v38, %v4077_v28 }
 0x79f   :  { %v2106_v63 = vpop.permute.xlu0 %2105 }
 0x7a0   :  { %v2235_v37 = vadd.f32 %v2106_v63, %v1990_v26  ;;  %v5036_v27 = vpop.f32.mrb[100].mxu1 }
 0x7a1   :  { %2163 = vrot.lane.b32.xlu1 %v5036_v27, %s3629_s10  ;;  %v3314_v62 = vpop.f32.mrb[101].mxu1 }
 0x7a2   :  { %v2284_v31 = vmax.f32 %v2235_v37, 0.0 }
 0x7a3   :  { %v2108_v49 = vpop.permute.xlu1 %2107 }
 0x7a4   :  { %v3403_v45 = vpack.c.bf16 %v2284_v31, %v2283_v43  ;;  %v5042_v44 = vpop.f32.mrb[102].mxu1  ;;  %v2236_v1 = vadd.f32 %v2108_v49, %v1991_v20 }
 0x7a5   :  { %2165 = vrot.lane.b32.xlu0 %v5042_v44, %s3629_s10  ;;  %v3317_v34 = vpop.f32.mrb[103].mxu1 }
 0x7a6   :  { %3404 = vmatprep.subr.bf16.mxu0 %v3403_v45  ;;  %v2285_v6 = vmax.f32 %v2236_v1, 0.0  ;;  %v1997_v1 = vmul.f32 %v4898_v3, %v4103_v48  ;;  %v2000_v48 = vmul.f32 %v4910_v12, %v4137_v9 }
 0x7a7   :  { %3406 = vmatpush3.bf16.msra.mxu0 %v4932_v51  ;;  %v2110_v30 = vpop.permute.xlu0 %2109 }
 0x7a8   :  { %v2237_v41 = vadd.f32 %v2110_v30, %v1992_v25  ;;  %v5049_v5 = vpop.f32.mrb[104].mxu1 }
 0x7a9   :  { %2167 = vrot.lane.b32.xlu1 %v5049_v5, %s3629_s10  ;;  %v3320_v8 = vpop.f32.mrb[105].mxu1 }
 0x7aa   :  { %v2286_v35 = vmax.f32 %v2237_v41, 0.0 }
 0x7ab   :  { %v2112_v26 = vpop.permute.xlu1 %2111 }
 0x7ac   :  { %v3407_v63 = vpack.c.bf16 %v2286_v35, %v2285_v6  ;;  %v2238_v37 = vadd.f32 %v2112_v26, %v1993_v0  ;;  %v1999_v6 = vmul.f32 %v4906_v32, %v4132_v24 }
 0x7ae   :  { %3408 = vmatprep.subr.bf16.mxu0 %v3407_v63  ;;  %v2287_v43 = vmax.f32 %v2238_v37, 0.0  ;;  %v5266_v63 = vld [vmem:[#allocation9_spill] sm:$0xff] }
 0x7af   :  { %3410 = vmatpush3.bf16.msra.mxu0 %v4950_v19  ;;  %v2114_v51 = vpop.permute.xlu0 %2113 }
 0x7b0   :  { %v2239_v62 = vadd.f32 %v2114_v51, %v1994_v42  ;;  %v2001_v42 = vmul.f32 %v5267_v47, %v5266_v63  ;;  %v5268_v51 = vld [vmem:[#allocation10_spill] sm:$0xff]  ;;  %v5277_v63 = vld [vmem:[#allocation16_spill] sm:$0xff] }
 0x7b2   :  { %v2288_v31 = vmax.f32 %v2239_v62, 0.0  ;;  %v5269_v62 = vld [vmem:[#allocation34_spill] sm:$0xff] }
 0x7b3   :  { %v2116_v49 = vpop.permute.xlu1 %2115  ;;  %v2002_v24 = vmul.f32 %v5269_v62, %v5268_v51 }
 0x7b4   :  { %v3411_v20 = vpack.c.bf16 %v2288_v31, %v2287_v43  ;;  %v2240_v61 = vadd.f32 %v2116_v49, %v1995_v21  ;;  %v5270_v49 = vld [vmem:[#allocation12_spill] sm:$0xff] }
 0x7b5   :  { %v2003_v21 = vmul.f32 %v4926_v29, %v5270_v49 }
 0x7b6   :  { %3412 = vmatprep.subr.bf16.mxu0 %v3411_v20  ;;  %v2289_v34 = vmax.f32 %v2240_v61, 0.0 }
 0x7b7   :  { %3414 = vmatpush3.bf16.msra.mxu0 %v4964_v50  ;;  %v2118_v57 = vpop.permute.xlu0 %2117 }
 0x7b8   :  { %v2241_v45 = vadd.f32 %v2118_v57, %v1996_v60  ;;  %v5271_v60 = vld [vmem:[#allocation13_spill] sm:$0xff] }
 0x7b9   :  { %v2004_v61 = vmul.f32 %v4934_v4, %v5271_v60 }
 0x7ba   :  { %v2290_v19 = vmax.f32 %v2241_v45, 0.0 }
 0x7bb   :  { %v2120_v25 = vpop.permute.xlu1 %2119 }
 0x7bc   :  { %v3415_v30 = vpack.c.bf16 %v2290_v19, %v2289_v34  ;;  %v2242_v18 = vadd.f32 %v2120_v25, %v1997_v1  ;;  %v5272_v19 = vld [vmem:[#allocation8_spill] sm:$0xff]  ;;  %v5273_v1 = vld [vmem:[#allocation7_spill] sm:$0xff] }
 0x7be   :  { %3416 = vmatprep.subr.bf16.mxu0 %v3415_v30  ;;  %v2291_v41 = vmax.f32 %v2242_v18, 0.0  ;;  %v1988_v30 = vmul.f32 %v4864_v39, %v5273_v1  ;;  %v5285_v1 = vld [vmem:[#allocation21_spill] sm:$0xff] }
 0x7bf   :  { %3418 = vmatpush3.bf16.msra.mxu0 %v4978_v33  ;;  %v2122_v28 = vpop.permute.xlu0 %2121 }
 0x7c0   :  { %v2243_v38 = vadd.f32 %v2122_v28, %v1998_v23 }
 0x7c2   :  { %v2292_v50 = vmax.f32 %v2243_v38, 0.0 }
 0x7c3   :  { %v2124_v8 = vpop.permute.xlu1 %2123 }
 0x7c4   :  { %v3419_v35 = vpack.c.bf16 %v2292_v50, %v2291_v41  ;;  %v2244_v3 = vadd.f32 %v2124_v8, %v1999_v6  ;;  %v5274_v41 = vld [vmem:[#allocation14_spill] sm:$0xff] }
 0x7c5   :  { %v2005_v4 = vmul.f32 %v4942_v2, %v5274_v41  ;;  %v2007_v2 = vmul.f32 %v4958_v56, %v5277_v63 }
 0x7c6   :  { %3420 = vmatprep.subr.bf16.mxu0 %v3419_v35  ;;  %v2293_v26 = vmax.f32 %v2244_v3, 0.0 }
 0x7c7   :  { %3422 = vmatpush3.bf16.msra.mxu0 %v4992_v54  ;;  %v2126_v52 = vpop.permute.xlu0 %2125 }
 0x7c8   :  { %v2245_v10 = vadd.f32 %v2126_v52, %v2000_v48 }
 0x7ca   :  { %v2294_v33 = vmax.f32 %v2245_v10, 0.0 }
 0x7cb   :  { %v2128_v0 = vpop.permute.xlu1 %2127 }
 0x7cc   :  { %v3423_v37 = vpack.c.bf16 %v2294_v33, %v2293_v26  ;;  %v2246_v32 = vadd.f32 %v2128_v0, %v2001_v42  ;;  %v5276_v0 = vmov 0.0|0.0   ;;  %v5278_v42 = vmov 1.0  }
 0x7ce   :  { %3424 = vmatprep.subr.bf16.mxu0 %v3423_v37  ;;  %v2295_v43 = vmax.f32 %v2246_v32, 0.0 }
 0x7cf   :  { %3426 = vmatpush3.bf16.msra.mxu0 %v5006_v58  ;;  %v2130_v9 = vpop.permute.xlu0 %2129  ;;  %v1987_v58 = vmul.f32 %v4862_v17, %v5272_v19  ;;  %v5284_v19 = vld [vmem:[#allocation20_spill] sm:$0xff] }
 0x7d0   :  { %v2247_v12 = vadd.f32 %v2130_v9, %v2002_v24  ;;  %v5281_v24 = vld [vmem:[#allocation32_spill] sm:$0xff] }
 0x7d2   :  { %v2296_v54 = vmax.f32 %v2247_v12, 0.0 }
 0x7d3   :  { %v2132_v31 = vpop.permute.xlu1 %2131 }
 0x7d4   :  { %v3427_v20 = vpack.c.bf16 %v2296_v54, %v2295_v43  ;;  %v2248_v57 = vadd.f32 %v2132_v31, %v2003_v21  ;;  %v5282_v54 = vld [vmem:[#allocation18_spill] sm:$0xff]  ;;  %v5283_v21 = vld [vmem:[#allocation19_spill] sm:$0xff] }
 0x7d5   :  { %v2009_v31 = vmul.f32 %v4972_v14, %v5282_v54  ;;  %v2012_v14 = vmul.f32 %v4994_v15, %v5285_v1 }
 0x7d6   :  { %3428 = vmatprep.subr.bf16.mxu0 %v3427_v20  ;;  %v2297_v23 = vmax.f32 %v2248_v57, 0.0  ;;  %v2010_v20 = vmul.f32 %v4980_v59, %v5283_v21 }
 0x7d7   :  { %3430 = vmatpush3.bf16.msra.mxu0 %v5018_v16  ;;  %v2100_v45 = vpop.permute.xlu1 %2099  ;;  %v2134_v34 = vpop.permute.xlu0 %2133  ;;  %v5275_v16 = vld [vmem:[#allocation15_spill] sm:$0xff] }
 0x7d8   :  { %v2249_v25 = vadd.f32 %v2134_v34, %v2004_v61  ;;  %v2232_v18 = vadd.f32 %v2100_v45, %v1987_v58  ;;  %v2006_v6 = vmul.f32 %v4952_v46, %v5275_v16  ;;  %v5280_v46 = vld [vmem:[#allocation17_spill] sm:$0xff]  ;;  %v2011_v58 = vmul.f32 %v4986_v7, %v5284_v19 }
 0x7d9   :  { %v2008_v51 = vmul.f32 %v4966_v11, %v5280_v46 }
 0x7da   :  { %v2298_v29 = vmax.f32 %v2249_v25, 0.0  ;;  %v2281_v35 = vmax.f32 %v2232_v18, 0.0 }
 0x7db   :  { %v2102_v28 = vpop.permute.xlu0 %2101  ;;  %v2136_v38 = vpop.permute.xlu1 %2135 }
 0x7dc   :  { %v3431_v50 = vpack.c.bf16 %v2298_v29, %v2297_v23  ;;  %v2233_v8 = vadd.f32 %v2102_v28, %v1988_v30  ;;  %v2250_v17 = vadd.f32 %v2136_v38, %v2005_v4  ;;  %v5286_v38 = vld [vmem:[#allocation22_spill] sm:$0xff] }
 0x7dd   :  { %v2013_v41 = vmul.f32 %v5000_v36, %v5286_v38  ;;  %v2807_v38 = vld [vmem:[%s5176_s1 + $0x27] ss:$0 sm:$0xff] }
 0x7de   :  { %v2282_v48 = vmax.f32 %v2233_v8, 0.0  ;;  %3432 = vmatprep.subr.bf16.mxu0 %v3431_v50  ;;  %v2299_v10 = vmax.f32 %v2250_v17, 0.0  ;;  %v5287_v50 = vld [vmem:[#allocation23_spill] sm:$0xff]  ;;  %v5288_v17 = vld [vmem:[#allocation24_spill] sm:$0xff] }
 0x7df   :  { %v2138_v3 = vpop.permute.xlu0 %2137  ;;  %v2014_v7 = vmul.f32 %v5008_v53, %v5287_v50 }
 0x7e0   :  { %v3433_v52 = vpack.c.bf16 %v2282_v48, %v2281_v35  ;;  %v2251_v39 = vadd.f32 %v2138_v3, %v2006_v6  ;;  %v2015_v3 = vmul.f32 %v5014_v55, %v5288_v17 }
 0x7e2   :  { %v2300_v26 = vmax.f32 %v2251_v39, 0.0  ;;  %3434 = vmatpush3.bf16.msra.mxu0 %v3433_v52  ;;  %v5289_v39 = vld [vmem:[#allocation25_spill] sm:$0xff] }
 0x7e3   :  { %v2140_v33 = vpop.permute.xlu1 %2139  ;;  %3435 = vmatprep.subr.bf16.mxu0 %v5276_v0  ;;  %v2016_v36 = vmul.f32 %v5020_v13, %v5289_v39 }
 0x7e4   :  { %v3436_v47 = vpack.c.bf16 %v2300_v26, %v2299_v10  ;;  %v2252_v62 = vadd.f32 %v2140_v33, %v2007_v2 }
 0x7e5   :  { %2804 = vmatmul.mubr.msk.f32.vlgmr.msra.gmra.mrb[98].mxu0 %vm4347_vm12, %v5278_v42  ;;  %vm2543_vm12 = vcmask 1044480  }
 0x7e6   :  { %3437 = vmatpush1.bf16.msra.mxu0 %v3436_v47  ;;  %2805 = vmatprep.mubr.msk.f32.mxu0 %vm1189_vm13, %v5281_v24  ;;  %v2301_v12 = vmax.f32 %v2252_v62, 0.0  ;;  %v5290_v47 = vld [vmem:[#allocation26_spill] sm:$0xff]  ;;  %vm3630_vm13 = vmmov 1  }
 0x7e7   :  { %v2142_v32 = vpop.permute.xlu0 %2141  ;;  %3438 = vmatprep.subr.bf16.mxu0 %v5276_v0  ;;  %v2017_v37 = vmul.f32 %v5024_v40, %v5290_v47 }
 0x7e8   :  { %v2253_v9 = vadd.f32 %v2142_v32, %v2008_v51  ;;  %v5291_v51 = vld [vmem:[#allocation27_spill] sm:$0xff] }
 0x7e9   :  { %v2018_v55 = vmul.f32 %v5030_v22, %v5291_v51 }
 0x7ea   :  { %v2302_v43 = vmax.f32 %v2253_v9, 0.0 }
 0x7eb   :  { %v2144_v56 = vpop.permute.xlu1 %2143 }
 0x7ec   :  { %v3439_v49 = vpack.c.bf16 %v2302_v43, %v2301_v12  ;;  %v2254_v11 = vadd.f32 %v2144_v56, %v2009_v31  ;;  %v5292_v43 = vld [vmem:[#allocation28_spill] sm:$0xff]  ;;  %v5293_v31 = vld [vmem:[#allocation29_spill] sm:$0xff] }
 0x7ed   :  { %v2019_v56 = vmul.f32 %v5036_v27, %v5292_v43  ;;  %v2020_v40 = vmul.f32 %v5042_v44, %v5293_v31  ;;  %v5295_v27 = vmov 0.0  }
 0x7ee   :  { %3440 = vmatpush1.bf16.msra.mxu0 %v3439_v49  ;;  %v2303_v57 = vmax.f32 %v2254_v11, 0.0 }
 0x7ef   :  { %v2146_v60 = vpop.permute.xlu0 %2145  ;;  %3441 = vmatprep.subr.bf16.mxu0 %v5276_v0 }
 0x7f0   :  { %v2255_v61 = vadd.f32 %v2146_v60, %v2010_v20  ;;  %v5294_v20 = vld [vmem:[#allocation30_spill] sm:$0xff] }
 0x7f1   :  { %v2021_v11 = vmul.f32 %v5049_v5, %v5294_v20  ;;  %v21_v5 = vld [vmem:[%s5176_s1 + $0x28] sm:$0xff] }
 0x7f2   :  { %v2304_v45 = vmax.f32 %v2255_v61, 0.0 }
 0x7f3   :  { %v2148_v34 = vpop.permute.xlu1 %2147 }
 0x7f4   :  { %v3442_v25 = vpack.c.bf16 %v2304_v45, %v2303_v57  ;;  %v2256_v30 = vadd.f32 %v2148_v34, %v2011_v58  ;;  %v22_v58 = vld [vmem:[%s5176_s1 + $0x30] sm:$0xff] }
 0x7f6   :  { %3443 = vmatpush1.bf16.msra.mxu0 %v3442_v25  ;;  %v2305_v18 = vmax.f32 %v2256_v30, 0.0  ;;  %v3460_v25 = vpack.c.bf16 %v22_v58, %v21_v5 }
 0x7f7   :  { %v2150_v23 = vpop.permute.xlu0 %2149  ;;  %3444 = vmatprep.subr.bf16.mxu0 %v5276_v0 }
 0x7f8   :  { %v2257_v59 = vadd.f32 %v2150_v23, %v2012_v14 }
 0x7fa   :  { %v2306_v29 = vmax.f32 %v2257_v59, 0.0 }
 0x7fb   :  { %v2152_v28 = vpop.permute.xlu1 %2151 }
 0x7fc   :  { %v3445_v4 = vpack.c.bf16 %v2306_v29, %v2305_v18  ;;  %v2258_v8 = vadd.f32 %v2152_v28, %v2013_v41  ;;  %v23_v29 = vld [vmem:[%s5176_s1 + $0x38] sm:$0xff] }
 0x7fe   :  { %3446 = vmatpush1.bf16.msra.mxu0 %v3445_v4  ;;  %v2307_v6 = vmax.f32 %v2258_v8, 0.0  ;;  %v2809_v8 = vld [vmem:[%s5176_s1 + $0x45] ss:$0 sm:$0xff] }
 0x7ff   :  { %v2154_v16 = vpop.permute.xlu0 %2153  ;;  %3447 = vmatprep.subr.bf16.mxu0 %v5276_v0 }
 0x800   :  { %v2259_v15 = vadd.f32 %v2154_v16, %v2014_v7 }
 0x802   :  { %v2308_v35 = vmax.f32 %v2259_v15, 0.0 }
 0x803   :  { %v2156_v48 = vpop.permute.xlu1 %2155 }
 0x804   :  { %v3448_v52 = vpack.c.bf16 %v2308_v35, %v2307_v6  ;;  %v2260_v10 = vadd.f32 %v2156_v48, %v2015_v3 }
 0x806   :  { %3449 = vmatpush1.bf16.msra.mxu0 %v3448_v52  ;;  %v2309_v33 = vmax.f32 %v2260_v10, 0.0 }
 0x807   :  { %v2158_v26 = vpop.permute.xlu0 %2157  ;;  %3450 = vmatprep.subr.bf16.mxu0 %v5276_v0 }
 0x808   :  { %v2261_v53 = vadd.f32 %v2158_v26, %v2016_v36 }
 0x80a   :  { %v2310_v63 = vmax.f32 %v2261_v53, 0.0 }
 0x80b   :  { %v2160_v2 = vpop.permute.xlu1 %2159 }
 0x80c   :  { %v3451_v46 = vpack.c.bf16 %v2310_v63, %v2309_v33  ;;  %v2262_v62 = vadd.f32 %v2160_v2, %v2017_v37 }
 0x80e   :  { %3452 = vmatpush1.bf16.msra.mxu0 %v3451_v46  ;;  %v2311_v32 = vmax.f32 %v2262_v62, 0.0 }
 0x80f   :  { %v2162_v24 = vpop.permute.xlu0 %2161  ;;  %3453 = vmatprep.subr.bf16.mxu0 %v5276_v0 }
 0x810   :  { %v2263_v13 = vadd.f32 %v2162_v24, %v2018_v55 }
 0x812   :  { %v2312_v9 = vmax.f32 %v2263_v13, 0.0 }
 0x813   :  { %v2164_v12 = vpop.permute.xlu1 %2163 }
 0x814   :  { %v3454_v54 = vpack.c.bf16 %v2312_v9, %v2311_v32  ;;  %v2264_v49 = vadd.f32 %v2164_v12, %v2019_v56 }
 0x816   :  { %3455 = vmatpush1.bf16.msra.mxu0 %v3454_v54  ;;  %v2313_v60 = vmax.f32 %v2264_v49, 0.0 }
 0x817   :  { %v2166_v21 = vpop.permute.xlu0 %2165  ;;  %3456 = vmatprep.subr.bf16.mxu0 %v5276_v0 }
 0x818   :  { %v2265_v22 = vadd.f32 %v2166_v21, %v2020_v40 }
 0x81a   :  { %v2314_v61 = vmax.f32 %v2265_v22, 0.0 }
 0x81b   :  { %v2168_v57 = vpop.permute.xlu1 %2167 }
 0x81c   :  { %v3457_v45 = vpack.c.bf16 %v2314_v61, %v2313_v60  ;;  %v2266_v34 = vadd.f32 %v2168_v57, %v2021_v11 }
 0x81e   :  { %3458 = vmatpush1.bf16.msra.mxu0 %v3457_v45  ;;  %v2315_v19 = vmax.f32 %v2266_v34, 0.0 }
 0x81f   :  { %2418 = vmatprep.subr.mxu0 %v5295_v27 }
 0x822   :  { %2419 = vmatpush1.msra.mxu0 %v2315_v19 }
 0x823   :  { %2806 = vmatmul.mubr.msk.f32.vlgmr.msra.gmra.mrb[100].mxu0 %vm4403_vm1, %v5278_v42  ;;  %3459 = vmatprep.subr.bf16.mxu0 %v5276_v0  ;;  %vm3464_vm1 = vmpackc.low %vm2543_vm12, %vm3630_vm13 }
 0x824   :  { %3325 = vmatprep.mubr.msk.f32.mxu0 %vm3623_vm0, %v5295_v27  ;;  %3461 = vmatpush3.bf16.msra.mxu0 %v3460_v25 }
 0x825   :  { %3462 = vmatprep.subr.bf16.mxu0 %v5276_v0  ;;  %v24_v0 = vld [vmem:[%s5176_s1 + $0x40] sm:$0x1f] }
 0x826   :  { %v3463_v28 = vpack.c.bf16 %v24_v0, %v23_v29 }
 0x8b8   :  { %v2990_v1 = vpop.f32.mrb[98].mxu0 }
 0x8b9   :  { %v2991_v14 = vpop.f32.mrb[99].mxu0 }
 0x8ba   :  { %v2992_v42 = vadd.f32 %v2991_v14, %v2990_v1 }
 0x8f6   :  { %v2452_v30 = vpop.f32.mrb[100].mxu0 }
 0x8f7   :  { %v2453_v23 = vadd.f32 %v2992_v42, %v2452_v30  ;;  %v2454_v59 = vpop.f32.mrb[101].mxu0 }
 0x8f9   :  { %v2456_v18 = vmul.f32 0.020408163, %v2453_v23 }
 0x8fb   :  { %3326 = vmatmul.mubr.msk.f32.vlgmr.msra.gmra.mrb[102].mxu0 %vm1139_vm6, %v2456_v18 }
 0x8fc   :  { %3332 = vmatprep.mubr.msk.f32.mxu0 %vm3623_vm0, %v5295_v27  ;;  %3465 = vmatpush3.bf16.msk.msra.mxu0 %vm3464_vm1, %v3463_v28  ;;  %vm2539_vm0 = vcmask 105472  }
 0x9ce   :  { %v2530_v41 = vpop.f32.mrb[102].mxu0 }
 0x9cf   :  { %v2531_v4 = vadd.f32 %v2807_v38, %v2530_v41  ;;  %v3327_v50 = vpop.f32.mrb[103].mxu0 }
 0x9d1   :  { %v2534_v7 = vmax.f32 %v2531_v4, 0.0 }
 0x9d3   :  { %3333 = vmatmul.mubr.msk.f32.vlgmr.msra.gmra.mrb[104].mxu0 %vm2539_vm0, %v2534_v7 }
 0xaa6   :  { %v2613_v16 = vpop.f32.mrb[104].mxu0 }
 0xaa7   :  { %v2614_v15 = vadd.f32 %v2809_v8, %v2613_v16  ;;  %v3334_v6 = vpop.f32.mrb[105].mxu0 }
 0xaa9   :  { %2617 = vst [vmem:[#allocation2] sm:$0xff] %v2614_v15 }
 0xaaa   :  { %3609 = shalt.err (!%p3606_p4)
}
 0xaab   :  { %s3610_s30 = scalar_lea.hbm %s5177_s2, 128 }
 0xaac   :  { %p3611_p5 = scmp.ne.s32.totalorder %s5177_s2, %s3610_s30  ;;  %p3614_p6 = scmp.lt.u32.totalorder %s3610_s30, %s5177_s2 }
 0xaae   :  { %p3616_p7 = pnand %p3614_p6, %p3611_p5 }
 0xab0   :  { %3619 = shalt.err (!%p3616_p7)
}
 0xab1   :  { %2627 = dma.vmem_to_hbm [thread:$0]  %s2625_s26, 128, %s5177_s2, [#allocation3]  }
 0xab2   :  { %3620 = dma.done.wait [#allocation3], 128  }
 0xab3   :  { %3621 = vsyncadd [#allocation3], 4294967168 }
 0xab4   :  { %2631 = vsyncpa [#allocation3], 1 }

</bundles_post_ra>
